<compile_context>
chip_gen: v7x
topology: tpu7x:2x2x1
jax: 0.10.0
libtpu: 0.0.40
codegen_flags: <defaults>
</compile_context>

<pallas_src>
import functools
import math

import jax
import jax.numpy as jnp
from jax.experimental import pallas as pl
from jax.experimental.pallas import tpu as pltpu

_VMEM_LIMIT = 32 * 1024 * 1024


# ----------------------------- helpers -----------------------------

def _rmsnorm_f32(x, eps=1e-6):
    x = x.astype(jnp.float32)
    return x * jax.lax.rsqrt(jnp.mean(x * x, axis=-1, keepdims=True) + eps)


def _row_tile(m, tm):
    tm = min(tm, m)
    assert m % tm == 0, (m, tm)
    return tm


def make_rotary_tables(T, head_dim):
    inv_freq = 1.0 / (10000.0 ** (jnp.arange(0, head_dim, 2, dtype=jnp.float32)
                                  / head_dim))
    t = jnp.arange(T, dtype=jnp.float32)
    freqs = jnp.outer(t, inv_freq)            # (T, head_dim // 2)
    return jnp.cos(freqs), jnp.sin(freqs)


# ----------------------------- kernel bodies -----------------------------

def rms_qkv_kernel(x_ref, w_ref, o_ref):
    """o = rmsnorm(x) @ Wqkv   (bf16 MXU operands, f32 accumulation)."""
    xn = _rmsnorm_f32(x_ref[...]).astype(jnp.bfloat16)
    o_ref[...] = jnp.dot(xn, w_ref[...],
                         preferred_element_type=jnp.float32).astype(o_ref.dtype)


def proj_residual_kernel(y_ref, w_ref, r_ref, o_ref):
    """o = r + y @ Wproj   (attention output projection + residual add)."""
    acc = jnp.dot(y_ref[...].astype(jnp.bfloat16), w_ref[...],
                  preferred_element_type=jnp.float32)
    o_ref[...] = (r_ref[...].astype(jnp.float32) + acc).astype(o_ref.dtype)


def mlp_residual_kernel(x_ref, w1_ref, w2_ref, w3_ref, o_ref):
    """o = x + (silu(rmsnorm(x)@W1) * (rmsnorm(x)@W2)) @ W3."""
    x = x_ref[...].astype(jnp.float32)
    xn = _rmsnorm_f32(x).astype(jnp.bfloat16)
    h1 = jnp.dot(xn, w1_ref[...], preferred_element_type=jnp.float32)
    h2 = jnp.dot(xn, w2_ref[...], preferred_element_type=jnp.float32)
    h = (jax.nn.silu(h1) * h2).astype(jnp.bfloat16)
    y = jnp.dot(h, w3_ref[...], preferred_element_type=jnp.float32)
    o_ref[...] = (x + y).astype(o_ref.dtype)


def flash_attn_kernel(q_ref, k_ref, v_ref, cq_ref, sq_ref, ck_ref, sk_ref,
                      o_ref, m_sc, l_sc, acc_sc, *, scale, t_q, t_k):
    """Flash-style causal attention for one (batch, head, q-tile); kv innermost."""
    qi = pl.program_id(2)
    ki = pl.program_id(3)
    n_kv = pl.num_programs(3)

    @pl.when(ki == 0)
    def _init():
        m_sc[...] = jnp.full_like(m_sc, -1e30)
        l_sc[...] = jnp.zeros_like(l_sc)
        acc_sc[...] = jnp.zeros_like(acc_sc)

    q_last = (qi + 1) * t_q - 1
    k_first = ki * t_k

    @pl.when(k_first <= q_last)          # skip fully-masked kv blocks (causal)
    def _compute():
        d_half = q_ref.shape[-1] // 2
        q = q_ref[0].astype(jnp.float32)   # (t_q, D)
        k = k_ref[0].astype(jnp.float32)   # (t_k, D)

        # rotary via rotate-half: y = x*cos_full + roll(x, D/2)*sin_signed
        qr = q * cq_ref[...] + pltpu.roll(q, d_half, 1) * sq_ref[...]
        kr = k * ck_ref[...] + pltpu.roll(k, d_half, 1) * sk_ref[...]

        s = jax.lax.dot_general(
            qr.astype(jnp.bfloat16), kr.astype(jnp.bfloat16),
            (((1,), (1,)), ((), ())),
            preferred_element_type=jnp.float32) * scale     # (t_q, t_k)

        row = jax.lax.broadcasted_iota(jnp.int32, s.shape, 0) + qi * t_q
        col = jax.lax.broadcasted_iota(jnp.int32, s.shape, 1) + ki * t_k
        s = jnp.where(col <= row, s, jnp.float32(-1e30))

        m_prev = m_sc[...]
        m_new = jnp.maximum(m_prev, jnp.max(s, axis=-1, keepdims=True))
        alpha = jnp.exp(m_prev - m_new)
        p = jnp.exp(s - m_new)
        l_sc[...] = alpha * l_sc[...] + jnp.sum(p, axis=-1, keepdims=True)
        acc_sc[...] = alpha * acc_sc[...] + jnp.dot(
            p.astype(jnp.bfloat16), v_ref[0].astype(jnp.bfloat16),
            preferred_element_type=jnp.float32)
        m_sc[...] = m_new

    @pl.when(ki == n_kv - 1)
    def _finalize():
        inv_l = pl.reciprocal(l_sc[...], approx=True)
        o_ref[0] = (acc_sc[...] * inv_l).astype(o_ref.dtype)


# ----------------------------- pallas_call wrappers -----------------------------

def rms_qkv_proj(x2d, w, *, tm=256):
    M, C = x2d.shape
    N = w.shape[1]
    tm = _row_tile(M, tm)
    return pl.pallas_call(
        rms_qkv_kernel,
        out_shape=jax.ShapeDtypeStruct((M, N), x2d.dtype),
        grid=(M // tm,),
        in_specs=[pl.BlockSpec((tm, C), lambda i: (i, 0)),
                  pl.BlockSpec((C, N), lambda i: (0, 0))],
        out_specs=pl.BlockSpec((tm, N), lambda i: (i, 0)),
        compiler_params=pltpu.CompilerParams(
            dimension_semantics=("parallel",),
            vmem_limit_bytes=_VMEM_LIMIT),
    )(x2d, w)


def proj_residual(y2d, w, r2d, *, tm=256):
    M, K = y2d.shape
    N = w.shape[1]
    tm = _row_tile(M, tm)
    return pl.pallas_call(
        proj_residual_kernel,
        out_shape=jax.ShapeDtypeStruct((M, N), r2d.dtype),
        grid=(M // tm,),
        in_specs=[pl.BlockSpec((tm, K), lambda i: (i, 0)),
                  pl.BlockSpec((K, N), lambda i: (0, 0)),
                  pl.BlockSpec((tm, N), lambda i: (i, 0))],
        out_specs=pl.BlockSpec((tm, N), lambda i: (i, 0)),
        input_output_aliases={2: 0},     # residual stream updated in place
        compiler_params=pltpu.CompilerParams(
            dimension_semantics=("parallel",),
            vmem_limit_bytes=_VMEM_LIMIT),
    )(y2d, w, r2d)


def mlp_residual(x2d, w1, w2, w3, *, tm=256):
    M, C = x2d.shape
    Hd = w1.shape[1]
    tm = _row_tile(M, tm)
    return pl.pallas_call(
        mlp_residual_kernel,
        out_shape=jax.ShapeDtypeStruct((M, C), x2d.dtype),
        grid=(M // tm,),
        in_specs=[pl.BlockSpec((tm, C), lambda i: (i, 0)),
                  pl.BlockSpec((C, Hd), lambda i: (0, 0)),
                  pl.BlockSpec((C, Hd), lambda i: (0, 0)),
                  pl.BlockSpec((Hd, C), lambda i: (0, 0))],
        out_specs=pl.BlockSpec((tm, C), lambda i: (i, 0)),
        input_output_aliases={0: 0},     # residual stream updated in place
        compiler_params=pltpu.CompilerParams(
            dimension_semantics=("parallel",),
            vmem_limit_bytes=_VMEM_LIMIT),
    )(x2d, w1, w2, w3)


def causal_attention(qkv, cos_full, sin_sgn, *, n_head, out_dtype, tq=128, tk=128):
    B, T, threeC = qkv.shape
    C = threeC // 3
    H = n_head
    D = C // H
    tq = _row_tile(T, tq)
    tk = _row_tile(T, tk)
    grid = (B, H, T // tq, T // tk)

    kernel = functools.partial(flash_attn_kernel,
                               scale=1.0 / math.sqrt(D), t_q=tq, t_k=tk)
    return pl.pallas_call(
        kernel,
        out_shape=jax.ShapeDtypeStruct((B, T, C), out_dtype),
        grid=grid,
        in_specs=[
            # q / k / v sliced straight out of the (B, T, 3C) qkv buffer.
            pl.BlockSpec((1, tq, D), lambda b, h, q, k: (b, q, h)),
            pl.BlockSpec((1, tk, D), lambda b, h, q, k: (b, k, H + h)),
            pl.BlockSpec((1, tk, D), lambda b, h, q, k: (b, k, 2 * H + h)),
            pl.BlockSpec((tq, D), lambda b, h, q, k: (q, 0)),
            pl.BlockSpec((tq, D), lambda b, h, q, k: (q, 0)),
            pl.BlockSpec((tk, D), lambda b, h, q, k: (k, 0)),
            pl.BlockSpec((tk, D), lambda b, h, q, k: (k, 0)),
        ],
        out_specs=pl.BlockSpec((1, tq, D), lambda b, h, q, k: (b, q, h)),
        scratch_shapes=[pltpu.VMEM((tq, 1), jnp.float32),   # running max
                        pltpu.VMEM((tq, 1), jnp.float32),   # running denom
                        pltpu.VMEM((tq, D), jnp.float32)],  # output accumulator
        compiler_params=pltpu.CompilerParams(
            dimension_semantics=("parallel", "parallel", "parallel", "arbitrary"),
            vmem_limit_bytes=_VMEM_LIMIT),
    )(qkv, qkv, qkv, cos_full, sin_sgn, cos_full, sin_sgn)


# ----------------------------- Block forward -----------------------------

@functools.partial(jax.jit, static_argnames=("n_head",))
def block_forward(x, params, *, n_head):
    B, T, C = x.shape
    H = n_head
    D = C // H

    # bf16 weights for native MXU throughput (accumulation stays f32 in-kernel)
    w_attn = params["w_attn"].astype(jnp.bfloat16)
    w_cproj = params["w_cproj"].astype(jnp.bfloat16)
    w_fc1 = params["w_fc1"].astype(jnp.bfloat16)
    w_fc2 = params["w_fc2"].astype(jnp.bfloat16)
    w_mproj = params["w_mproj"].astype(jnp.bfloat16)

    x2d = x.reshape(B * T, C)

    # attention branch: qkv = rmsnorm(x) @ Wqkv, viewed as (B, T, 3C)
    qkv = rms_qkv_proj(x2d, w_attn).reshape(B, T, 3 * C)

    cos, sin = make_rotary_tables(T, D)
    cos_full = jnp.concatenate([cos, cos], axis=-1)      # (T, D)
    sin_sgn = jnp.concatenate([sin, -sin], axis=-1)      # rotate-half signs

    # flash attention writes its output directly in (B, T, C) head-major layout
    y = causal_attention(qkv, cos_full, sin_sgn, n_head=H, out_dtype=x.dtype)

    # residual + attention output projection
    x2d = proj_residual(y.reshape(B * T, C), w_cproj, x2d)

    # fused MLP branch (rmsnorm + fc1/fc2 + silu*mul + proj + residual)
    x2d = mlp_residual(x2d, w_fc1, w_fc2, w_mproj)

    return x2d.reshape(B, T, C)


# ----------------------------- pure-JAX reference -----------------------------

def _rms_ref(x, eps=1e-6):
    xf = x.astype(jnp.float32)
    return (xf * jax.lax.rsqrt(jnp.mean(xf * xf, axis=-1, keepdims=True) + eps)
            ).astype(x.dtype)


def block_forward_ref(x, params, *, n_head):
    B, T, C = x.shape
    H = n_head
    D = C // H
    xn = _rms_ref(x)
    qkv = xn @ params["w_attn"]
    q, k, v = jnp.split(qkv, 3, axis=2)
    q = q.reshape(B, T, H, D)
    k = k.reshape(B, T, H, D)
    v = v.reshape(B, T, H, D)
    cos, sin = make_rotary_tables(T, D)
    cos4 = cos[None, :, None, :]
    sin4 = sin[None, :, None, :]

    def rot(z):
        d = D // 2
        z1, z2 = z[..., :d], z[..., d:]
        return jnp.concatenate([z1 * cos4 + z2 * sin4,
                                -z1 * sin4 + z2 * cos4], axis=3)

    q, k = rot(q), rot(k)
    q = q.transpose(0, 2, 1, 3)
    k = k.transpose(0, 2, 1, 3)
    v = v.transpose(0, 2, 1, 3)
    s = jnp.einsum("bhqd,bhkd->bhqk", q, k) / math.sqrt(D)
    mask = jnp.tril(jnp.ones((T, T), dtype=bool))
    s = jnp.where(mask[None, None], s, -jnp.inf)
    p = jax.nn.softmax(s, axis=-1)
    y = jnp.einsum("bhqk,bhkd->bhqd", p, v)
    y = y.transpose(0, 2, 1, 3).reshape(B, T, C)
    x = x + y @ params["w_cproj"]
    xn = _rms_ref(x)
    h = jax.nn.silu(xn @ params["w_fc1"]) * (xn @ params["w_fc2"])
    return x + h @ params["w_mproj"]


# ----------------------------- main -----------------------------

if __name__ == "__main__":
    # small but lane-aligned shapes: head_dim = 128 so rotary roll / blocks are
    # clean 128-lane tiles.
    B, T, C, H = 2, 16, 256, 2
    key = jax.random.PRNGKey(0)
    kx, k1, k2, k3, k4, k5 = jax.random.split(key, 6)

    x = jax.random.normal(kx, (B, T, C), dtype=jnp.float32)

    # nn.Linear(in, out, bias=False) weights are (out, in); store transposed (in, out).
    params = {
        "w_attn":  0.02 * jax.random.normal(k1, (C, 3 * C), dtype=jnp.float32),
        "w_cproj": 0.02 * jax.random.normal(k2, (C, C), dtype=jnp.float32),
        "w_fc1":   0.02 * jax.random.normal(k3, (C, 2 * C), dtype=jnp.float32),
        "w_fc2":   0.02 * jax.random.normal(k4, (C, 2 * C), dtype=jnp.float32),
        "w_mproj": 0.02 * jax.random.normal(k5, (2 * C, C), dtype=jnp.float32),
    }

    out = jax.block_until_ready(block_forward(x, params, n_head=H))
    ref = jax.block_until_ready(block_forward_ref(x, params, n_head=H))

    assert out.shape == (B, T, C)
    assert jnp.allclose(out, ref, atol=2e-2, rtol=2e-2), "mismatch vs reference"

    print("KERNEL_OK")
</pallas_src>

<mosaic_0001>
module attributes {stable_mosaic.version = 11 : i64} {
  func.func @rms_qkv_kernel(%arg0: i32, %arg1: memref<32x256xf32, #tpu.memory_space<vmem>>, %arg2: memref<256x768xbf16, #tpu.memory_space<vmem>>, %arg3: memref<32x768xf32, #tpu.memory_space<vmem>>) attributes {dimension_semantics = [#tpu.dimension_semantics<parallel>], iteration_bounds = array<i64: 1>, scalar_prefetch = 0 : i64, scratch_operands = 0 : i64, tpu.core_type = #tpu.core_type<tc>, window_params = [{transform_indices = @transform_0, window_bounds = array<i64: 32, 256>}, {pipeline_mode = #tpu.pipeline_mode<synchronous>, transform_indices = @transform_1, window_bounds = array<i64: 256, 768>}, {transform_indices = @transform_2, window_bounds = array<i64: 32, 768>}]} {
    %c0 = arith.constant 0 : index
    %c0_0 = arith.constant 0 : index
    %0 = vector.load %arg1[%c0, %c0_0] : memref<32x256xf32, #tpu.memory_space<vmem>>, vector<32x256xf32>
    %1 = arith.mulf %0, %0 : vector<32x256xf32>
    %cst = arith.constant dense<0.000000e+00> : vector<32xf32>
    %2 = vector.multi_reduction <add>, %1, %cst [1] : vector<32x256xf32> to vector<32xf32>
    %3 = vector.shape_cast %2 : vector<32xf32> to vector<32x1xf32>
    %cst_1 = arith.constant 2.560000e+02 : f32
    %4 = vector.broadcast %cst_1 : f32 to vector<32x1xf32>
    %5 = arith.divf %3, %4 : vector<32x1xf32>
    %cst_2 = arith.constant 9.99999997E-7 : f32
    %6 = vector.broadcast %cst_2 : f32 to vector<32x1xf32>
    %7 = arith.addf %5, %6 : vector<32x1xf32>
    %8 = math.rsqrt %7 : vector<32x1xf32>
    %9 = vector.broadcast %8 : vector<32x1xf32> to vector<32x256xf32>
    %10 = arith.mulf %0, %9 : vector<32x256xf32>
    %11 = arith.truncf %10 : vector<32x256xf32> to vector<32x256xbf16>
    %c0_3 = arith.constant 0 : index
    %c0_4 = arith.constant 0 : index
    %12 = vector.load %arg2[%c0_3, %c0_4] : memref<256x768xbf16, #tpu.memory_space<vmem>>, vector<256x768xbf16>
    %cst_5 = arith.constant dense<0.000000e+00> : vector<32x768xf32>
    %13 = tpu.matmul %11, %12, %cst_5 {dimension_numbers = #tpu.dot_dimension_numbers<[1], [0], [0], [1], [0, 0, 1, 1], [], []>} : vector<32x256xbf16>, vector<256x768xbf16>, vector<32x768xf32> -> vector<32x768xf32>
    %c0_6 = arith.constant 0 : index
    %c0_7 = arith.constant 0 : index
    %14 = vector.load %arg3[%c0_6, %c0_7] : memref<32x768xf32, #tpu.memory_space<vmem>>, vector<32x768xf32>
    tpu.vector_store %arg3[%c0_6, %c0_7], %13 {strides = array<i32>} : memref<32x768xf32, #tpu.memory_space<vmem>>, vector<32x768xf32>,
    return
  }
  func.func @transform_0(%arg0: i32) -> (i32, i32) {
    %c0_i32 = arith.constant 0 : i32
    %c0_i32_0 = arith.constant 0 : i32
    return %arg0, %c0_i32 : i32, i32
  }
  func.func @transform_1(%arg0: i32) -> (i32, i32) {
    %c0_i32 = arith.constant 0 : i32
    %c0_i32_0 = arith.constant 0 : i32
    %c0_i32_1 = arith.constant 0 : i32
    return %c0_i32, %c0_i32_0 : i32, i32
  }
  func.func @transform_2(%arg0: i32) -> (i32, i32) {
    %c0_i32 = arith.constant 0 : i32
    %c0_i32_0 = arith.constant 0 : i32
    return %arg0, %c0_i32 : i32, i32
  }
}

module attributes {stable_mosaic.version = 11 : i64} {
  func.func @flash_attn_kernel(%arg0: i32, %arg1: i32, %arg2: i32, %arg3: i32, %arg4: memref<1x16x128xf32, #tpu.memory_space<vmem>>, %arg5: memref<1x16x128xf32, #tpu.memory_space<vmem>>, %arg6: memref<1x16x128xf32, #tpu.memory_space<vmem>>, %arg7: memref<16x128xf32, #tpu.memory_space<vmem>>, %arg8: memref<16x128xf32, #tpu.memory_space<vmem>>, %arg9: memref<16x128xf32, #tpu.memory_space<vmem>>, %arg10: memref<16x128xf32, #tpu.memory_space<vmem>>, %arg11: memref<1x16x128xf32, #tpu.memory_space<vmem>>, %arg12: memref<16x1xf32, #tpu.memory_space<vmem>>, %arg13: memref<16x1xf32, #tpu.memory_space<vmem>>, %arg14: memref<16x128xf32, #tpu.memory_space<vmem>>) attributes {dimension_semantics = [#tpu.dimension_semantics<parallel>, #tpu.dimension_semantics<parallel>, #tpu.dimension_semantics<parallel>, #tpu.dimension_semantics<arbitrary>], iteration_bounds = array<i64: 2, 2, 1, 1>, scalar_prefetch = 0 : i64, scratch_operands = 3 : i64, tpu.core_type = #tpu.core_type<tc>, window_params = [{transform_indices = @transform_0, window_bounds = array<i64: 1, 16, 128>}, {transform_indices = @transform_1, window_bounds = array<i64: 1, 16, 128>}, {transform_indices = @transform_2, window_bounds = array<i64: 1, 16, 128>}, {transform_indices = @transform_3, window_bounds = array<i64: 16, 128>}, {transform_indices = @transform_4, window_bounds = array<i64: 16, 128>}, {transform_indices = @transform_5, window_bounds = array<i64: 16, 128>}, {transform_indices = @transform_6, window_bounds = array<i64: 16, 128>}, {transform_indices = @transform_7, window_bounds = array<i64: 1, 16, 128>}]} {
    %c0_i32 = arith.constant 0 : i32
    %0 = arith.cmpi eq, %arg3, %c0_i32 : i32
    %1 = arith.extui %0 : i1 to i32
    %c0_i32_0 = arith.constant 0 : i32
    %2 = arith.cmpi ne, %1, %c0_i32_0 : i32
    scf.if %2 {
      %cst = arith.constant -1.000000e+30 : f32
      %13 = vector.broadcast %cst : f32 to vector<16x1xf32>
      %c0 = arith.constant 0 : index
      %c0_6 = arith.constant 0 : index
      %14 = vector.load %arg12[%c0, %c0_6] : memref<16x1xf32, #tpu.memory_space<vmem>>, vector<16x1xf32>
      tpu.vector_store %arg12[%c0, %c0_6], %13 {strides = array<i32>} : memref<16x1xf32, #tpu.memory_space<vmem>>, vector<16x1xf32>,
      %cst_7 = arith.constant 0.000000e+00 : f32
      %15 = vector.broadcast %cst_7 : f32 to vector<16x1xf32>
      %c0_8 = arith.constant 0 : index
      %c0_9 = arith.constant 0 : index
      %16 = vector.load %arg13[%c0_8, %c0_9] : memref<16x1xf32, #tpu.memory_space<vmem>>, vector<16x1xf32>
      tpu.vector_store %arg13[%c0_8, %c0_9], %15 {strides = array<i32>} : memref<16x1xf32, #tpu.memory_space<vmem>>, vector<16x1xf32>,
      %cst_10 = arith.constant 0.000000e+00 : f32
      %17 = vector.broadcast %cst_10 : f32 to vector<16x128xf32>
      %c0_11 = arith.constant 0 : index
      %c0_12 = arith.constant 0 : index
      %18 = vector.load %arg14[%c0_11, %c0_12] : memref<16x128xf32, #tpu.memory_space<vmem>>, vector<16x128xf32>
      tpu.vector_store %arg14[%c0_11, %c0_12], %17 {strides = array<i32>} : memref<16x128xf32, #tpu.memory_space<vmem>>, vector<16x128xf32>,
    } else {
    }
    %c1_i32 = arith.constant 1 : i32
    %3 = arith.addi %arg2, %c1_i32 : i32
    %c16_i32 = arith.constant 16 : i32
    %4 = arith.muli %3, %c16_i32 : i32
    %c1_i32_1 = arith.constant 1 : i32
    %5 = arith.subi %4, %c1_i32_1 : i32
    %c16_i32_2 = arith.constant 16 : i32
    %6 = arith.muli %arg3, %c16_i32_2 : i32
    %7 = arith.cmpi sle, %6, %5 : i32
    %8 = arith.extui %7 : i1 to i32
    %c0_i32_3 = arith.constant 0 : i32
    %9 = arith.cmpi ne, %8, %c0_i32_3 : i32
    scf.if %9 {
      %c0 = arith.constant 0 : index
      %c0_6 = arith.constant 0 : index
      %c0_7 = arith.constant 0 : index
      %13 = vector.load %arg4[%c0, %c0_6, %c0_7] : memref<1x16x128xf32, #tpu.memory_space<vmem>>, vector<1x16x128xf32>
      %14 = vector.shape_cast %13 : vector<1x16x128xf32> to vector<16x128xf32>
      %c0_8 = arith.constant 0 : index
      %c0_9 = arith.constant 0 : index
      %c0_10 = arith.constant 0 : index
      %15 = vector.load %arg5[%c0_8, %c0_9, %c0_10] : memref<1x16x128xf32, #tpu.memory_space<vmem>>, vector<1x16x128xf32>
      %16 = vector.shape_cast %15 : vector<1x16x128xf32> to vector<16x128xf32>
      %c0_11 = arith.constant 0 : index
      %c0_12 = arith.constant 0 : index
      %17 = vector.load %arg7[%c0_11, %c0_12] : memref<16x128xf32, #tpu.memory_space<vmem>>, vector<16x128xf32>
      %18 = arith.mulf %14, %17 : vector<16x128xf32>
      %c64_i32 = arith.constant 64 : i32
      %19 = tpu.dynamic_rotate %14 by %c64_i32 dim 1 : vector<16x128xf32>, i32 -> vector<16x128xf32>
      %c0_13 = arith.constant 0 : index
      %c0_14 = arith.constant 0 : index
      %20 = vector.load %arg8[%c0_13, %c0_14] : memref<16x128xf32, #tpu.memory_space<vmem>>, vector<16x128xf32>
      %21 = arith.mulf %19, %20 : vector<16x128xf32>
      %22 = arith.addf %18, %21 : vector<16x128xf32>
      %c0_15 = arith.constant 0 : index
      %c0_16 = arith.constant 0 : index
      %23 = vector.load %arg9[%c0_15, %c0_16] : memref<16x128xf32, #tpu.memory_space<vmem>>, vector<16x128xf32>
      %24 = arith.mulf %16, %23 : vector<16x128xf32>
      %c64_i32_17 = arith.constant 64 : i32
      %25 = tpu.dynamic_rotate %16 by %c64_i32_17 dim 1 : vector<16x128xf32>, i32 -> vector<16x128xf32>
      %c0_18 = arith.constant 0 : index
      %c0_19 = arith.constant 0 : index
      %26 = vector.load %arg10[%c0_18, %c0_19] : memref<16x128xf32, #tpu.memory_space<vmem>>, vector<16x128xf32>
      %27 = arith.mulf %25, %26 : vector<16x128xf32>
      %28 = arith.addf %24, %27 : vector<16x128xf32>
      %29 = arith.truncf %22 : vector<16x128xf32> to vector<16x128xbf16>
      %30 = arith.truncf %28 : vector<16x128xf32> to vector<16x128xbf16>
      %cst = arith.constant dense<0.000000e+00> : vector<16x16xf32>
      %31 = tpu.matmul %29, %30, %cst {dimension_numbers = #tpu.dot_dimension_numbers<[1], [1], [0], [0], [0, 0, 1, 0], [], []>} : vector<16x128xbf16>, vector<16x128xbf16>, vector<16x16xf32> -> vector<16x16xf32>
      %cst_20 = arith.constant 0.0883883461 : f32
      %32 = vector.broadcast %cst_20 : f32 to vector<16x16xf32>
      %33 = arith.mulf %31, %32 : vector<16x16xf32>
      %34 = tpu.iota {dimensions = array<i32: 0>} : vector<16x16xi32>
      %c16_i32_21 = arith.constant 16 : i32
      %35 = arith.muli %arg2, %c16_i32_21 : i32
      %36 = vector.broadcast %35 : i32 to vector<16x16xi32>
      %37 = arith.addi %34, %36 : vector<16x16xi32>
      %38 = tpu.iota {dimensions = array<i32: 1>} : vector<16x16xi32>
      %c16_i32_22 = arith.constant 16 : i32
      %39 = arith.muli %arg3, %c16_i32_22 : i32
      %40 = vector.broadcast %39 : i32 to vector<16x16xi32>
      %41 = arith.addi %38, %40 : vector<16x16xi32>
      %42 = arith.cmpi sle, %41, %37 : vector<16x16xi32>
      %cst_23 = arith.constant -1.000000e+30 : f32
      %43 = vector.broadcast %cst_23 : f32 to vector<16x16xf32>
      %44 = arith.select %42, %33, %43 : vector<16x16xi1>, vector<16x16xf32>
      %c0_24 = arith.constant 0 : index
      %c0_25 = arith.constant 0 : index
      %45 = vector.load %arg12[%c0_24, %c0_25] : memref<16x1xf32, #tpu.memory_space<vmem>>, vector<16x1xf32>
      %cst_26 = arith.constant dense<0xFF800000> : vector<16xf32>
      %46 = vector.multi_reduction <maximumf>, %44, %cst_26 [1] : vector<16x16xf32> to vector<16xf32>
      %47 = vector.shape_cast %46 : vector<16xf32> to vector<16x1xf32>
      %48 = arith.maximumf %45, %47 : vector<16x1xf32>
      %49 = arith.subf %45, %48 : vector<16x1xf32>
      %50 = math.exp %49 : vector<16x1xf32>
      %51 = vector.broadcast %48 : vector<16x1xf32> to vector<16x16xf32>
      %52 = arith.subf %44, %51 : vector<16x16xf32>
      %53 = math.exp %52 : vector<16x16xf32>
      %c0_27 = arith.constant 0 : index
      %c0_28 = arith.constant 0 : index
      %54 = vector.load %arg13[%c0_27, %c0_28] : memref<16x1xf32, #tpu.memory_space<vmem>>, vector<16x1xf32>
      %55 = arith.mulf %50, %54 : vector<16x1xf32>
      %cst_29 = arith.constant dense<0.000000e+00> : vector<16xf32>
      %56 = vector.multi_reduction <add>, %53, %cst_29 [1] : vector<16x16xf32> to vector<16xf32>
      %57 = vector.shape_cast %56 : vector<16xf32> to vector<16x1xf32>
      %58 = arith.addf %55, %57 : vector<16x1xf32>
      %c0_30 = arith.constant 0 : index
      %c0_31 = arith.constant 0 : index
      %59 = vector.load %arg13[%c0_30, %c0_31] : memref<16x1xf32, #tpu.memory_space<vmem>>, vector<16x1xf32>
      tpu.vector_store %arg13[%c0_30, %c0_31], %58 {strides = array<i32>} : memref<16x1xf32, #tpu.memory_space<vmem>>, vector<16x1xf32>,
      %c0_32 = arith.constant 0 : index
      %c0_33 = arith.constant 0 : index
      %60 = vector.load %arg14[%c0_32, %c0_33] : memref<16x128xf32, #tpu.memory_space<vmem>>, vector<16x128xf32>
      %61 = vector.broadcast %50 : vector<16x1xf32> to vector<16x128xf32>
      %62 = arith.mulf %61, %60 : vector<16x128xf32>
      %63 = arith.truncf %53 : vector<16x16xf32> to vector<16x16xbf16>
      %c0_34 = arith.constant 0 : index
      %c0_35 = arith.constant 0 : index
      %c0_36 = arith.constant 0 : index
      %64 = vector.load %arg6[%c0_34, %c0_35, %c0_36] : memref<1x16x128xf32, #tpu.memory_space<vmem>>, vector<1x16x128xf32>
      %65 = vector.shape_cast %64 : vector<1x16x128xf32> to vector<16x128xf32>
      %66 = arith.truncf %65 : vector<16x128xf32> to vector<16x128xbf16>
      %cst_37 = arith.constant dense<0.000000e+00> : vector<16x128xf32>
      %67 = tpu.matmul %63, %66, %cst_37 {dimension_numbers = #tpu.dot_dimension_numbers<[1], [0], [0], [1], [0, 0, 1, 1], [], []>} : vector<16x16xbf16>, vector<16x128xbf16>, vector<16x128xf32> -> vector<16x128xf32>
      %68 = arith.addf %62, %67 : vector<16x128xf32>
      %c0_38 = arith.constant 0 : index
      %c0_39 = arith.constant 0 : index
      %69 = vector.load %arg14[%c0_38, %c0_39] : memref<16x128xf32, #tpu.memory_space<vmem>>, vector<16x128xf32>
      tpu.vector_store %arg14[%c0_38, %c0_39], %68 {strides = array<i32>} : memref<16x128xf32, #tpu.memory_space<vmem>>, vector<16x128xf32>,
      %c0_40 = arith.constant 0 : index
      %c0_41 = arith.constant 0 : index
      %70 = vector.load %arg12[%c0_40, %c0_41] : memref<16x1xf32, #tpu.memory_space<vmem>>, vector<16x1xf32>
      tpu.vector_store %arg12[%c0_40, %c0_41], %48 {strides = array<i32>} : memref<16x1xf32, #tpu.memory_space<vmem>>, vector<16x1xf32>,
    } else {
    }
    %c0_i32_4 = arith.constant 0 : i32
    %10 = arith.cmpi eq, %arg3, %c0_i32_4 : i32
    %11 = arith.extui %10 : i1 to i32
    %c0_i32_5 = arith.constant 0 : i32
    %12 = arith.cmpi ne, %11, %c0_i32_5 : i32
    scf.if %12 {
      %c0 = arith.constant 0 : index
      %c0_6 = arith.constant 0 : index
      %13 = vector.load %arg13[%c0, %c0_6] : memref<16x1xf32, #tpu.memory_space<vmem>>, vector<16x1xf32>
      %14 = tpu.reciprocal %13 {approx = true} : vector<16x1xf32> -> vector<16x1xf32>
      %c0_7 = arith.constant 0 : index
      %c0_8 = arith.constant 0 : index
      %15 = vector.load %arg14[%c0_7, %c0_8] : memref<16x128xf32, #tpu.memory_space<vmem>>, vector<16x128xf32>
      %16 = vector.broadcast %14 : vector<16x1xf32> to vector<16x128xf32>
      %17 = arith.mulf %15, %16 : vector<16x128xf32>
      %c0_9 = arith.constant 0 : index
      %c0_10 = arith.constant 0 : index
      %c0_11 = arith.constant 0 : index
      %18 = vector.load %arg11[%c0_9, %c0_10, %c0_11] : memref<1x16x128xf32, #tpu.memory_space<vmem>>, vector<1x16x128xf32>
      %19 = vector.shape_cast %18 : vector<1x16x128xf32> to vector<16x128xf32>
      %20 = vector.shape_cast %17 : vector<16x128xf32> to vector<1x16x128xf32>
      tpu.vector_store %arg11[%c0_9, %c0_10, %c0_11], %20 {strides = array<i32>} : memref<1x16x128xf32, #tpu.memory_space<vmem>>, vector<1x16x128xf32>,
    } else {
    }
    return
  }
  func.func @transform_0(%arg0: i32, %arg1: i32, %arg2: i32, %arg3: i32) -> (i32, i32, i32) {
    %c0_i32 = arith.constant 0 : i32
    return %arg0, %arg2, %arg1 : i32, i32, i32
  }
  func.func @transform_1(%arg0: i32, %arg1: i32, %arg2: i32, %arg3: i32) -> (i32, i32, i32) {
    %c2_i32 = arith.constant 2 : i32
    %0 = arith.addi %c2_i32, %arg1 : i32
    %c0_i32 = arith.constant 0 : i32
    return %arg0, %arg3, %0 : i32, i32, i32
  }
  func.func @transform_2(%arg0: i32, %arg1: i32, %arg2: i32, %arg3: i32) -> (i32, i32, i32) {
    %c4_i32 = arith.constant 4 : i32
    %0 = arith.addi %c4_i32, %arg1 : i32
    %c0_i32 = arith.constant 0 : i32
    return %arg0, %arg3, %0 : i32, i32, i32
  }
  func.func @transform_3(%arg0: i32, %arg1: i32, %arg2: i32, %arg3: i32) -> (i32, i32) {
    %c0_i32 = arith.constant 0 : i32
    %c0_i32_0 = arith.constant 0 : i32
    return %arg2, %c0_i32 : i32, i32
  }
  func.func @transform_4(%arg0: i32, %arg1: i32, %arg2: i32, %arg3: i32) -> (i32, i32) {
    %c0_i32 = arith.constant 0 : i32
    %c0_i32_0 = arith.constant 0 : i32
    return %arg2, %c0_i32 : i32, i32
  }
  func.func @transform_5(%arg0: i32, %arg1: i32, %arg2: i32, %arg3: i32) -> (i32, i32) {
    %c0_i32 = arith.constant 0 : i32
    %c0_i32_0 = arith.constant 0 : i32
    return %arg3, %c0_i32 : i32, i32
  }
  func.func @transform_6(%arg0: i32, %arg1: i32, %arg2: i32, %arg3: i32) -> (i32, i32) {
    %c0_i32 = arith.constant 0 : i32
    %c0_i32_0 = arith.constant 0 : i32
    return %arg3, %c0_i32 : i32, i32
  }
  func.func @transform_7(%arg0: i32, %arg1: i32, %arg2: i32, %arg3: i32) -> (i32, i32, i32) {
    %c0_i32 = arith.constant 0 : i32
    return %arg0, %arg2, %arg1 : i32, i32, i32
  }
}

module attributes {stable_mosaic.version = 11 : i64} {
  func.func @proj_residual_kernel(%arg0: i32, %arg1: memref<32x256xf32, #tpu.memory_space<vmem>>, %arg2: memref<256x256xbf16, #tpu.memory_space<vmem>>, %arg3: memref<32x256xf32, #tpu.memory_space<vmem>>, %arg4: memref<32x256xf32, #tpu.memory_space<vmem>>) attributes {dimension_semantics = [#tpu.dimension_semantics<parallel>], iteration_bounds = array<i64: 1>, scalar_prefetch = 0 : i64, scratch_operands = 0 : i64, tpu.core_type = #tpu.core_type<tc>, window_params = [{transform_indices = @transform_0, window_bounds = array<i64: 32, 256>}, {pipeline_mode = #tpu.pipeline_mode<synchronous>, transform_indices = @transform_1, window_bounds = array<i64: 256, 256>}, {transform_indices = @transform_2, window_bounds = array<i64: 32, 256>}, {transform_indices = @transform_3, window_bounds = array<i64: 32, 256>}]} {
    %c0 = arith.constant 0 : index
    %c0_0 = arith.constant 0 : index
    %0 = vector.load %arg1[%c0, %c0_0] : memref<32x256xf32, #tpu.memory_space<vmem>>, vector<32x256xf32>
    %1 = arith.truncf %0 : vector<32x256xf32> to vector<32x256xbf16>
    %c0_1 = arith.constant 0 : index
    %c0_2 = arith.constant 0 : index
    %2 = vector.load %arg2[%c0_1, %c0_2] : memref<256x256xbf16, #tpu.memory_space<vmem>>, vector<256x256xbf16>
    %cst = arith.constant dense<0.000000e+00> : vector<32x256xf32>
    %3 = tpu.matmul %1, %2, %cst {dimension_numbers = #tpu.dot_dimension_numbers<[1], [0], [0], [1], [0, 0, 1, 1], [], []>} : vector<32x256xbf16>, vector<256x256xbf16>, vector<32x256xf32> -> vector<32x256xf32>
    %c0_3 = arith.constant 0 : index
    %c0_4 = arith.constant 0 : index
    %4 = vector.load %arg3[%c0_3, %c0_4] : memref<32x256xf32, #tpu.memory_space<vmem>>, vector<32x256xf32>
    %5 = arith.addf %4, %3 : vector<32x256xf32>
    %c0_5 = arith.constant 0 : index
    %c0_6 = arith.constant 0 : index
    %6 = vector.load %arg4[%c0_5, %c0_6] : memref<32x256xf32, #tpu.memory_space<vmem>>, vector<32x256xf32>
    tpu.vector_store %arg4[%c0_5, %c0_6], %5 {strides = array<i32>} : memref<32x256xf32, #tpu.memory_space<vmem>>, vector<32x256xf32>,
    return
  }
  func.func @transform_0(%arg0: i32) -> (i32, i32) {
    %c0_i32 = arith.constant 0 : i32
    %c0_i32_0 = arith.constant 0 : i32
    return %arg0, %c0_i32 : i32, i32
  }
  func.func @transform_1(%arg0: i32) -> (i32, i32) {
    %c0_i32 = arith.constant 0 : i32
    %c0_i32_0 = arith.constant 0 : i32
    %c0_i32_1 = arith.constant 0 : i32
    return %c0_i32, %c0_i32_0 : i32, i32
  }
  func.func @transform_2(%arg0: i32) -> (i32, i32) {
    %c0_i32 = arith.constant 0 : i32
    %c0_i32_0 = arith.constant 0 : i32
    return %arg0, %c0_i32 : i32, i32
  }
  func.func @transform_3(%arg0: i32) -> (i32, i32) {
    %c0_i32 = arith.constant 0 : i32
    %c0_i32_0 = arith.constant 0 : i32
    return %arg0, %c0_i32 : i32, i32
  }
}

module attributes {stable_mosaic.version = 11 : i64} {
  func.func @mlp_residual_kernel(%arg0: i32, %arg1: memref<32x256xf32, #tpu.memory_space<vmem>>, %arg2: memref<256x512xbf16, #tpu.memory_space<vmem>>, %arg3: memref<256x512xbf16, #tpu.memory_space<vmem>>, %arg4: memref<512x256xbf16, #tpu.memory_space<vmem>>, %arg5: memref<32x256xf32, #tpu.memory_space<vmem>>) attributes {dimension_semantics = [#tpu.dimension_semantics<parallel>], iteration_bounds = array<i64: 1>, scalar_prefetch = 0 : i64, scratch_operands = 0 : i64, tpu.core_type = #tpu.core_type<tc>, window_params = [{transform_indices = @transform_0, window_bounds = array<i64: 32, 256>}, {pipeline_mode = #tpu.pipeline_mode<synchronous>, transform_indices = @transform_1, window_bounds = array<i64: 256, 512>}, {pipeline_mode = #tpu.pipeline_mode<synchronous>, transform_indices = @transform_2, window_bounds = array<i64: 256, 512>}, {pipeline_mode = #tpu.pipeline_mode<synchronous>, transform_indices = @transform_3, window_bounds = array<i64: 512, 256>}, {transform_indices = @transform_4, window_bounds = array<i64: 32, 256>}]} {
    %c0 = arith.constant 0 : index
    %c0_0 = arith.constant 0 : index
    %0 = vector.load %arg1[%c0, %c0_0] : memref<32x256xf32, #tpu.memory_space<vmem>>, vector<32x256xf32>
    %1 = arith.mulf %0, %0 : vector<32x256xf32>
    %cst = arith.constant dense<0.000000e+00> : vector<32xf32>
    %2 = vector.multi_reduction <add>, %1, %cst [1] : vector<32x256xf32> to vector<32xf32>
    %3 = vector.shape_cast %2 : vector<32xf32> to vector<32x1xf32>
    %cst_1 = arith.constant 2.560000e+02 : f32
    %4 = vector.broadcast %cst_1 : f32 to vector<32x1xf32>
    %5 = arith.divf %3, %4 : vector<32x1xf32>
    %cst_2 = arith.constant 9.99999997E-7 : f32
    %6 = vector.broadcast %cst_2 : f32 to vector<32x1xf32>
    %7 = arith.addf %5, %6 : vector<32x1xf32>
    %8 = math.rsqrt %7 : vector<32x1xf32>
    %9 = vector.broadcast %8 : vector<32x1xf32> to vector<32x256xf32>
    %10 = arith.mulf %0, %9 : vector<32x256xf32>
    %11 = arith.truncf %10 : vector<32x256xf32> to vector<32x256xbf16>
    %c0_3 = arith.constant 0 : index
    %c0_4 = arith.constant 0 : index
    %12 = vector.load %arg2[%c0_3, %c0_4] : memref<256x512xbf16, #tpu.memory_space<vmem>>, vector<256x512xbf16>
    %cst_5 = arith.constant dense<0.000000e+00> : vector<32x512xf32>
    %13 = tpu.matmul %11, %12, %cst_5 {dimension_numbers = #tpu.dot_dimension_numbers<[1], [0], [0], [1], [0, 0, 1, 1], [], []>} : vector<32x256xbf16>, vector<256x512xbf16>, vector<32x512xf32> -> vector<32x512xf32>
    %c0_6 = arith.constant 0 : index
    %c0_7 = arith.constant 0 : index
    %14 = vector.load %arg3[%c0_6, %c0_7] : memref<256x512xbf16, #tpu.memory_space<vmem>>, vector<256x512xbf16>
    %cst_8 = arith.constant dense<0.000000e+00> : vector<32x512xf32>
    %15 = tpu.matmul %11, %14, %cst_8 {dimension_numbers = #tpu.dot_dimension_numbers<[1], [0], [0], [1], [0, 0, 1, 1], [], []>} : vector<32x256xbf16>, vector<256x512xbf16>, vector<32x512xf32> -> vector<32x512xf32>
    %16 = arith.negf %13 : vector<32x512xf32>
    %17 = math.exp %16 : vector<32x512xf32>
    %cst_9 = arith.constant 1.000000e+00 : f32
    %18 = vector.broadcast %cst_9 : f32 to vector<32x512xf32>
    %19 = arith.addf %18, %17 : vector<32x512xf32>
    %20 = arith.divf %18, %19 : vector<32x512xf32>
    %21 = arith.mulf %13, %20 : vector<32x512xf32>
    %22 = arith.mulf %21, %15 : vector<32x512xf32>
    %23 = arith.truncf %22 : vector<32x512xf32> to vector<32x512xbf16>
    %c0_10 = arith.constant 0 : index
    %c0_11 = arith.constant 0 : index
    %24 = vector.load %arg4[%c0_10, %c0_11] : memref<512x256xbf16, #tpu.memory_space<vmem>>, vector<512x256xbf16>
    %cst_12 = arith.constant dense<0.000000e+00> : vector<32x256xf32>
    %25 = tpu.matmul %23, %24, %cst_12 {dimension_numbers = #tpu.dot_dimension_numbers<[1], [0], [0], [1], [0, 0, 1, 1], [], []>} : vector<32x512xbf16>, vector<512x256xbf16>, vector<32x256xf32> -> vector<32x256xf32>
    %26 = arith.addf %0, %25 : vector<32x256xf32>
    %c0_13 = arith.constant 0 : index
    %c0_14 = arith.constant 0 : index
    %27 = vector.load %arg5[%c0_13, %c0_14] : memref<32x256xf32, #tpu.memory_space<vmem>>, vector<32x256xf32>
    tpu.vector_store %arg5[%c0_13, %c0_14], %26 {strides = array<i32>} : memref<32x256xf32, #tpu.memory_space<vmem>>, vector<32x256xf32>,
    return
  }
  func.func @transform_0(%arg0: i32) -> (i32, i32) {
    %c0_i32 = arith.constant 0 : i32
    %c0_i32_0 = arith.constant 0 : i32
    return %arg0, %c0_i32 : i32, i32
  }
  func.func @transform_1(%arg0: i32) -> (i32, i32) {
    %c0_i32 = arith.constant 0 : i32
    %c0_i32_0 = arith.constant 0 : i32
    %c0_i32_1 = arith.constant 0 : i32
    return %c0_i32, %c0_i32_0 : i32, i32
  }
  func.func @transform_2(%arg0: i32) -> (i32, i32) {
    %c0_i32 = arith.constant 0 : i32
    %c0_i32_0 = arith.constant 0 : i32
    %c0_i32_1 = arith.constant 0 : i32
    return %c0_i32, %c0_i32_0 : i32, i32
  }
  func.func @transform_3(%arg0: i32) -> (i32, i32) {
    %c0_i32 = arith.constant 0 : i32
    %c0_i32_0 = arith.constant 0 : i32
    %c0_i32_1 = arith.constant 0 : i32
    return %c0_i32, %c0_i32_0 : i32, i32
  }
  func.func @transform_4(%arg0: i32) -> (i32, i32) {
    %c0_i32 = arith.constant 0 : i32
    %c0_i32_0 = arith.constant 0 : i32
    return %arg0, %c0_i32 : i32, i32
  }
}

</mosaic_0001>

<bundles_post_ra>
// kernel: block_forward.6
= control target key start
LH: loop header
LB: loop body
LE: loop exit
PB: predicated region body
PF: predicated region fallthrough
CT: control target
= control target key end

     0   :  { %s599_s1 = inlined_call_operand.vmem [shape: bf16[256,256], index: 1, kind: input, shape index: {}]   ;;  %s600_s0 = inlined_call_operand.vmem [shape: f32[32,256], index: 0, kind: input, shape index: {}]   ;;  %s601_s2 = inlined_call_operand.vmem [shape: f32[32,256], index: 2, kind: input, shape index: {}, may-alias: {2,3}]   ;;  %s602_s3 = inlined_call_operand.vmem [shape: f32[32,256], index: 3, kind: output, shape index: {}, may-alias: {2,3}]  }
   0x1   :  { %v363_v0 = vld [vmem:[%s599_s1 + $0x4] ss:$8 sps:$4 sm:$0xff]   ;;  %v365_v1 = vld [vmem:[%s599_s1] ss:$8 sps:$4 sm:$0xff]   ;;  %v366_v2 = vld [vmem:[%s599_s1 + $0x14] ss:$8 sps:$4 sm:$0xff]  }
   0x2   :  { %218 = vmatprep.subr.bf16.mxu0 %v363_v0  ;;  %331 = vmatprep.subr.bf16.mxu1 %v363_v0  ;;  %v368_v3 = vld [vmem:[%s599_s1 + $0x10] ss:$8 sps:$4 sm:$0xff]   ;;  %v369_v4 = vld [vmem:[%s599_s1 + $0x24] ss:$8 sps:$4 sm:$0xff]   ;;  %v371_v5 = vld [vmem:[%s599_s1 + $0x20] ss:$8 sps:$4 sm:$0xff]  }
   0x3   :  { %219 = vmatpush1.bf16.msra.mxu0 %v365_v1  ;;  %347 = vmatpush1.bf16.msra.mxu1 %v365_v1  ;;  %v372_v6 = vld [vmem:[%s599_s1 + $0x34] ss:$8 sps:$4 sm:$0xff]   ;;  %v374_v7 = vld [vmem:[%s599_s1 + $0x30] ss:$8 sps:$4 sm:$0xff]   ;;  %v375_v8 = vld [vmem:[%s599_s1 + $0x44] ss:$8 sps:$4 sm:$0xff]  }
   0x4   :  { %220 = vmatprep.subr.bf16.mxu0 %v366_v2  ;;  %332 = vmatprep.subr.bf16.mxu1 %v366_v2  ;;  %v377_v9 = vld [vmem:[%s599_s1 + $0x40] ss:$8 sps:$4 sm:$0xff]   ;;  %v378_v10 = vld [vmem:[%s599_s1 + $0x54] ss:$8 sps:$4 sm:$0xff]   ;;  %v380_v11 = vld [vmem:[%s599_s1 + $0x50] ss:$8 sps:$4 sm:$0xff]  }
   0x5   :  { %v381_v12 = vld [vmem:[%s599_s1 + $0x64] ss:$8 sps:$4 sm:$0xff]   ;;  %v17_v14 = vld [vmem:[%s600_s0 + $0x18] sm:$0xff]  ;;  %v383_v18 = vld [vmem:[%s599_s1 + $0x60] ss:$8 sps:$4 sm:$0xff]  }
   0x6   :  { %v15_v13 = vld [vmem:[%s600_s0 + $0x8] sm:$0xff]  ;;  %v21_v17 = vld [vmem:[%s600_s0 + $0x38] sm:$0xff]  ;;  %v14_v38 = vld [vmem:[%s600_s0] sm:$0xff] }
   0x7   :  { %221 = vmatpush1.bf16.msra.mxu0 %v368_v3  ;;  %348 = vmatpush1.bf16.msra.mxu1 %v368_v3  ;;  %v23_v15 = vpack.c.bf16 %v17_v14, %v15_v13  ;;  %v19_v16 = vld [vmem:[%s600_s0 + $0x28] sm:$0xff]  ;;  %v384_v20 = vld [vmem:[%s599_s1 + $0x74] ss:$8 sps:$4 sm:$0xff]   ;;  %v386_v21 = vld [vmem:[%s599_s1 + $0x70] ss:$8 sps:$4 sm:$0xff]  }
   0x8   :  { %222 = vmatprep.subr.bf16.mxu0 %v369_v4  ;;  %333 = vmatprep.subr.bf16.mxu1 %v369_v4  ;;  %v25_v19 = vpack.c.bf16 %v21_v17, %v19_v16  ;;  %v387_v22 = vld [vmem:[%s599_s1 + $0x84] ss:$8 sps:$4 sm:$0xff]   ;;  %v389_v23 = vld [vmem:[%s599_s1 + $0x80] ss:$8 sps:$4 sm:$0xff]   ;;  %v390_v24 = vld [vmem:[%s599_s1 + $0x94] ss:$8 sps:$4 sm:$0xff]  }
   0x9   :  { %250 = vmatprep.mubr.bf16.mxu0 %v23_v15  ;;  %v392_v25 = vld [vmem:[%s599_s1 + $0x90] ss:$8 sps:$4 sm:$0xff]   ;;  %v393_v26 = vld [vmem:[%s599_s1 + $0xa4] ss:$8 sps:$4 sm:$0xff]   ;;  %v395_v27 = vld [vmem:[%s599_s1 + $0xa0] ss:$8 sps:$4 sm:$0xff]  }
   0xa   :  { %260 = vmatprep.mubr.bf16.mxu1 %v25_v19  ;;  %v396_v28 = vld [vmem:[%s599_s1 + $0xb4] ss:$8 sps:$4 sm:$0xff]   ;;  %v398_v29 = vld [vmem:[%s599_s1 + $0xb0] ss:$8 sps:$4 sm:$0xff]   ;;  %v399_v30 = vld [vmem:[%s599_s1 + $0xc4] ss:$8 sps:$4 sm:$0xff]  }
   0xb   :  { %223 = vmatpush1.bf16.msra.mxu0 %v371_v5  ;;  %349 = vmatpush1.bf16.msra.mxu1 %v371_v5  ;;  %v401_v31 = vld [vmem:[%s599_s1 + $0xc0] ss:$8 sps:$4 sm:$0xff]   ;;  %v402_v32 = vld [vmem:[%s599_s1 + $0xd4] ss:$8 sps:$4 sm:$0xff]   ;;  %v404_v33 = vld [vmem:[%s599_s1 + $0xd0] ss:$8 sps:$4 sm:$0xff]  }
   0xc   :  { %224 = vmatprep.subr.bf16.mxu0 %v372_v6  ;;  %334 = vmatprep.subr.bf16.mxu1 %v372_v6  ;;  %v405_v34 = vld [vmem:[%s599_s1 + $0xe4] ss:$8 sps:$4 sm:$0xff]   ;;  %v407_v35 = vld [vmem:[%s599_s1 + $0xe0] ss:$8 sps:$4 sm:$0xff]   ;;  %v408_v36 = vld [vmem:[%s599_s1 + $0xf4] ss:$8 sps:$4 sm:$0xff]  }
   0xd   :  { %v410_v37 = vld [vmem:[%s599_s1 + $0xf0] ss:$8 sps:$4 sm:$0xff]   ;;  %v18_v40 = vld [vmem:[%s600_s0 + $0x20] sm:$0xff]  ;;  %v272_v46 = vld [vmem:[%s601_s2 + $0x8] sm:$0xff] }
   0xe   :  { %v16_v39 = vld [vmem:[%s600_s0 + $0x10] sm:$0xff]  ;;  %v271_v44 = vld [vmem:[%s601_s2] sm:$0xff]  ;;  %v276_v47 = vld [vmem:[%s601_s2 + $0x28] sm:$0xff] }
   0xf   :  { %225 = vmatpush1.bf16.msra.mxu0 %v374_v7  ;;  %350 = vmatpush1.bf16.msra.mxu1 %v374_v7  ;;  %v20_v41 = vld [vmem:[%s600_s0 + $0x30] sm:$0xff]  ;;  %v22_v42 = vpack.c.bf16 %v16_v39, %v14_v38  ;;  %v275_v45 = vld [vmem:[%s601_s2 + $0x20] sm:$0xff]  ;;  %v274_v56 = vld [vmem:[%s601_s2 + $0x18] sm:$0xff] }
  0x10   :  { %226 = vmatprep.subr.bf16.mxu0 %v375_v8  ;;  %335 = vmatprep.subr.bf16.mxu1 %v375_v8  ;;  %v24_v43 = vpack.c.bf16 %v20_v41, %v18_v40  ;;  %v273_v50 = vld [vmem:[%s601_s2 + $0x10] sm:$0xff]  ;;  %v278_v57 = vld [vmem:[%s601_s2 + $0x38] sm:$0xff] }
  0x11   :  { %v277_v51 = vld [vmem:[%s601_s2 + $0x30] sm:$0xff] }
  0x13   :  { %227 = vmatpush1.bf16.msra.mxu0 %v377_v9  ;;  %351 = vmatpush1.bf16.msra.mxu1 %v377_v9 }
  0x14   :  { %228 = vmatprep.subr.bf16.mxu0 %v378_v10  ;;  %336 = vmatprep.subr.bf16.mxu1 %v378_v10 }
  0x17   :  { %229 = vmatpush1.bf16.msra.mxu0 %v380_v11  ;;  %352 = vmatpush1.bf16.msra.mxu1 %v380_v11 }
  0x18   :  { %230 = vmatprep.subr.bf16.mxu0 %v381_v12  ;;  %337 = vmatprep.subr.bf16.mxu1 %v381_v12 }
  0x1b   :  { %231 = vmatpush1.bf16.msra.mxu0 %v383_v18  ;;  %353 = vmatpush1.bf16.msra.mxu1 %v383_v18 }
  0x1c   :  { %232 = vmatprep.subr.bf16.mxu0 %v384_v20  ;;  %338 = vmatprep.subr.bf16.mxu1 %v384_v20 }
  0x1f   :  { %233 = vmatpush1.bf16.msra.mxu0 %v386_v21  ;;  %354 = vmatpush1.bf16.msra.mxu1 %v386_v21 }
  0x20   :  { %234 = vmatprep.subr.bf16.mxu0 %v387_v22  ;;  %339 = vmatprep.subr.bf16.mxu1 %v387_v22 }
  0x23   :  { %235 = vmatpush1.bf16.msra.mxu0 %v389_v23  ;;  %355 = vmatpush1.bf16.msra.mxu1 %v389_v23 }
  0x24   :  { %236 = vmatprep.subr.bf16.mxu0 %v390_v24  ;;  %340 = vmatprep.subr.bf16.mxu1 %v390_v24 }
  0x27   :  { %237 = vmatpush1.bf16.msra.mxu0 %v392_v25  ;;  %356 = vmatpush1.bf16.msra.mxu1 %v392_v25 }
  0x28   :  { %238 = vmatprep.subr.bf16.mxu0 %v393_v26  ;;  %341 = vmatprep.subr.bf16.mxu1 %v393_v26 }
  0x2b   :  { %239 = vmatpush1.bf16.msra.mxu0 %v395_v27  ;;  %357 = vmatpush1.bf16.msra.mxu1 %v395_v27 }
  0x2c   :  { %240 = vmatprep.subr.bf16.mxu0 %v396_v28  ;;  %342 = vmatprep.subr.bf16.mxu1 %v396_v28 }
  0x2f   :  { %241 = vmatpush1.bf16.msra.mxu0 %v398_v29  ;;  %358 = vmatpush1.bf16.msra.mxu1 %v398_v29 }
  0x30   :  { %242 = vmatprep.subr.bf16.mxu0 %v399_v30  ;;  %343 = vmatprep.subr.bf16.mxu1 %v399_v30 }
  0x33   :  { %243 = vmatpush1.bf16.msra.mxu0 %v401_v31  ;;  %359 = vmatpush1.bf16.msra.mxu1 %v401_v31 }
  0x34   :  { %244 = vmatprep.subr.bf16.mxu0 %v402_v32  ;;  %344 = vmatprep.subr.bf16.mxu1 %v402_v32 }
  0x37   :  { %245 = vmatpush1.bf16.msra.mxu0 %v404_v33  ;;  %360 = vmatpush1.bf16.msra.mxu1 %v404_v33 }
  0x38   :  { %246 = vmatprep.subr.bf16.mxu0 %v405_v34  ;;  %345 = vmatprep.subr.bf16.mxu1 %v405_v34 }
  0x3b   :  { %247 = vmatpush1.bf16.msra.mxu0 %v407_v35  ;;  %361 = vmatpush1.bf16.msra.mxu1 %v407_v35 }
  0x3c   :  { %248 = vmatprep.subr.bf16.mxu0 %v408_v36  ;;  %346 = vmatprep.subr.bf16.mxu1 %v408_v36 }
  0x3f   :  { %249 = vmatpush1.bf16.msra.mxu0 %v410_v37  ;;  %362 = vmatpush1.bf16.msra.mxu1 %v410_v37 }
  0x42   :  { %251 = vmatmul.mubr.bf16.vlgmr.msra.gmra.mrb[0].mxu0 %v22_v42  ;;  %261 = vmatmul.mubr.bf16.vlgmr.msra.gmra.mrb[0].mxu1 %v24_v43 }
 0x115   :  { %v252_v48 = vpop.f32.mrb[0].mxu0  ;;  %v262_v49 = vpop.f32.mrb[0].mxu1 }
 0x116   :  { %v279_v52 = vadd.f32 %v271_v44, %v252_v48  ;;  %v283_v53 = vadd.f32 %v275_v45, %v262_v49  ;;  %v254_v54 = vpop.f32.mrb[1].mxu0  ;;  %v264_v55 = vpop.f32.mrb[1].mxu1 }
 0x117   :  { %v280_v58 = vadd.f32 %v272_v46, %v254_v54  ;;  %v284_v59 = vadd.f32 %v276_v47, %v264_v55  ;;  %v256_v60 = vpop.f32.mrb[2].mxu0  ;;  %v266_v61 = vpop.f32.mrb[2].mxu1 }
 0x118   :  { %287 = vst [vmem:[%s602_s3] sm:$0xff] %v279_v52  ;;  %291 = vst [vmem:[%s602_s3 + $0x20] sm:$0xff] %v283_v53  ;;  %v281_v62 = vadd.f32 %v273_v50, %v256_v60  ;;  %v285_v63 = vadd.f32 %v277_v51, %v266_v61  ;;  %v258_v0 = vpop.f32.mrb[3].mxu0  ;;  %v268_v1 = vpop.f32.mrb[3].mxu1 }
 0x119   :  { %288 = vst [vmem:[%s602_s3 + $0x8] sm:$0xff] %v280_v58  ;;  %292 = vst [vmem:[%s602_s3 + $0x28] sm:$0xff] %v284_v59  ;;  %v282_v2 = vadd.f32 %v274_v56, %v258_v0  ;;  %v286_v3 = vadd.f32 %v278_v57, %v268_v1 }
 0x11a   :  { %289 = vst [vmem:[%s602_s3 + $0x10] sm:$0xff] %v281_v62  ;;  %293 = vst [vmem:[%s602_s3 + $0x30] sm:$0xff] %v285_v63 }
 0x11b   :  { %290 = vst [vmem:[%s602_s3 + $0x18] sm:$0xff] %v282_v2  ;;  %294 = vst [vmem:[%s602_s3 + $0x38] sm:$0xff] %v286_v3 }

// kernel: block_forward.5
= control target key start
LH: loop header
LB: loop body
LE: loop exit
PB: predicated region body
PF: predicated region fallthrough
CT: control target
= control target key end

     0   :  { %s1590_s0 = inlined_call_operand.vmem [shape: f32[2,16,768], index: 0, kind: input, shape index: {}, may-alias: {0,1,2}]   ;;  %s1591_s1 = inlined_call_operand.vmem [shape: f32[2,16,768], index: 1, kind: input, shape index: {}, may-alias: {0,1,2}]   ;;  %s1592_s2 = inlined_call_operand.vmem [shape: f32[2,16,768], index: 2, kind: input, shape index: {}, may-alias: {0,1,2}]   ;;  %s1593_s3 = inlined_call_operand.vmem [shape: f32[16,128], index: 3, kind: input, shape index: {}, may-alias: {3,5}]   ;;  %s1594_s4 = inlined_call_operand.vmem [shape: f32[16,128], index: 4, kind: input, shape index: {}, may-alias: {4,6}]   ;;  %s1595_s5 = inlined_call_operand.vmem [shape: f32[16,128], index: 5, kind: input, shape index: {}, may-alias: {3,5}]   ;;  %s1596_s6 = inlined_call_operand.vmem [shape: f32[16,128], index: 6, kind: input, shape index: {}, may-alias: {4,6}]   ;;  %s1597_s7 = inlined_call_operand.vmem [shape: f32[2,16,256], index: 7, kind: output, shape index: {}]  }
   0x1   :  { %1602 = sst [smem:[#allocation14_spill]] %s1595_s5 }
   0x2   :  { %1603 = sst [smem:[#allocation15_spill]] %s1596_s6 }
   0x3   :  { %1604 = sst [smem:[#allocation16_spill]] %s1597_s7 }
   0x4   :  { %s1359_s24 = smov 0   ;;  %s1361_s25 = smov 0  }
   0x5   :  { %s1363_s26 = smov 0   ;;  %s1365_s27 = smov 0  }
   0x6   :  { %s1367_s28 = smov 0   ;;  %s1369_s29 = smov 0  }
   0x7   :  { %s1371_s30 = smov 0   ;;  %s1373_s8 = smov 0  }
   0x8   :  { %s1375_s9 = smov 0   ;;  %s1377_s10 = smov 0  }
   0x9   :  { %s1379_s11 = smov 0  }
   0xa LB: > { %1605 = sst [smem:[#allocation9_spill]] %s1296_s30  ;;  %s39_s13 = sadd.s32 1, %s1304_s9  ;;  %s1312_s11 = sphi %s1379_s11, %s17_s11   ;;  %s1308_s10 = sphi %s1377_s10, %s1634_s10   ;;  %s1304_s9 = sphi %s1375_s9, %s1633_s9   ;;  %s1300_s8 = sphi %s1373_s8, %s1632_s8   ;;  %s1296_s30 = sphi %s1371_s30, %s1631_s30   ;;  %s1292_s29 = sphi %s1369_s29, %s1630_s29   ;;  %s1288_s28 = sphi %s1367_s28, %s1629_s28   ;;  %s1284_s27 = sphi %s1365_s27, %s1628_s27   ;;  %s1280_s26 = sphi %s1363_s26, %s1627_s26   ;;  %s1276_s25 = sphi %s1361_s25, %s1626_s25   ;;  %s1272_s24 = sphi %s1359_s24, %s1625_s24  }
   0xb   : > { %1606 = sst [smem:[#allocation10_spill]] %s1300_s8  ;;  %p41_p0 = scmp.ge.s32.totalorder %s39_s13, 2 }
   0xc   : > { %s43_s14 = sadd.s32 1, %s1308_s10  ;;  %s54_s15 = sadd.s32 1, %s1292_s29 }
   0xd   : > { %p61_p1 = scmp.ne.s32.totalorder %s1292_s29, %s1288_s28  ;;  %s1636_s13 = smov (%p41_p0, %s39_s13), 0 }
   0xe   : > { %1607 = sst [smem:[#allocation11_spill]] %s1636_s13  ;;  %s1638_s14 = smov (!%p41_p0, %s43_s14), %s1308_s10 }
   0xf   : > { %s50_s16 = ssub.s32 %s1304_s9, %s1636_s13  ;;  %p62_p2 = scmp.eq.s32.totalorder %s1312_s11, 0 }
  0x10   : > { %p45_p3 = scmp.ge.s32.totalorder %s1638_s14, 2  ;;  %s77_s17 = sadd.s32 2, %s1304_s9 }
  0x11   : > { %p1432_p4 = por %p62_p2, %p61_p1  ;;  %s78_s19 = sadd.s32 2, %s1636_s13 }
  0x12   : > { %s1640_s14 = smov (%p45_p3, %s1638_s14), 0  ;;  %s82_s20 = ssub.s32 %s77_s17, %s78_s19 }
  0x13   : > { %1609 = sst [smem:[#allocation12_spill]] %s1640_s14  ;;  %s86_s21 = sadd.s32 1, %s1284_s27 }
  0x14   : > { %s47_s22 = ssub.s32 %s1308_s10, %s1640_s14  ;;  %p93_p5 = scmp.ne.s32.totalorder %s1284_s27, %s1280_s26 }
  0x15   : > { %s51_s23 = sor.u32 %s50_s16, %s47_s22  ;;  %s83_s12 = sor.u32 %s82_s20, %s47_s22 }
  0x16   : > { %p52_p6 = scmp.eq.s32.totalorder %s51_s23, 0  ;;  %p84_p7 = scmp.eq.s32.totalorder %s83_s12, 0 }
  0x17   : > { %p1446_p8 = por %p93_p5, %p62_p2  ;;  %s109_s30 = sadd.s32 4, %s1304_s9 }
  0x18   : > { %s1452_s8 = scalar_select %p52_p6, %s1292_s29, %s54_s15  }
  0x19   : > { %s1455_s17 = scalar_select %p84_p7, %s1284_s27, %s86_s21  }
  0x1a   : > { %1611 = sst [smem:[#allocation13_spill]] %s1452_s8  ;;  %s110_s19 = sadd.s32 4, %s1636_s13 }
  0x1b   : > { %s118_s14 = sadd.s32 1, %s1276_s25  ;;  %s114_s6 = ssub.s32 %s109_s30, %s110_s19 }
  0x1c   : > { %p125_p9 = scmp.ne.s32.totalorder %s1276_s25, %s1272_s24  ;;  %s115_s16 = sor.u32 %s114_s6, %s47_s22 }
  0x1d   : > { %s1612_s5 = sadd.s32 4294967295, %s1312_s11   ;;  %p116_p11 = scmp.eq.s32.totalorder %s115_s16, 0 }
  0x1e   : > { %p263_p10 = scmp.eq.s32.totalorder %s1612_s5, 3  ;;  %p1465_p12 = por %p125_p9, %p62_p2 }
  0x1f   : > { %s1477_s15 = scalar_select %p116_p11, %s1276_s25, %s118_s14  }
  0x20   : > { %p1472_p13 = por %p263_p10, %p61_p1  ;;  %p1080_p0 = scmp.ge.s32.totalorder %s1312_s11, 4 }
  0x22   : > { %321 = sbr.rel (%p1080_p0) target bundleno = 65 (0x41), region = 32 }
  0x29   : > { %324 = sbr.rel (!%p1432_p4) target bundleno = 49 (0x31), region = 36  ;;  %s326_s5 = sand.u32 (%p1432_p4), 1, %s1292_s29  }
  0x2a   : > { %s1118_s6 = smul.u32 (%p1432_p4), 12, %s1308_s10  ;;  %s1081_s30 = sshll.u32 (%p1432_p4), %s326_s5, 4 }
  0x2b   : > { %s328_s14 = scalar_lea.vmem (%p1432_p4), [#allocation5], %s1081_s30 }
  0x2c   : > { %s333_s21 = sadd.s32 (%p1432_p4), %s1304_s9, %s1118_s6 }
  0x2d   : > { %s1082_s22 = sshll.u32 (%p1432_p4), %s333_s21, 3 }
  0x2e   : > { %s335_s16 = scalar_lea.vmem (%p1432_p4), %s1590_s0, %s1082_s22 }
  0x2f   : > { %v365_v0 = vld [vmem:[%s335_s16] sm:$0xff] (%p1432_p4)  ;;  %v367_v1 = vld [vmem:[%s335_s16 + $0x30] sm:$0xff] (%p1432_p4) }
  0x30   : > { %366 = vst [vmem:[%s328_s14] sm:$0xff] %v365_v0  ;;  %368 = vst [vmem:[%s328_s14 + $0x8] sm:$0xff] %v367_v1 }
  0x31 PF: > { %374 = sbr.rel (!%p1446_p8) target bundleno = 57 (0x39), region = 74  ;;  %s376_s18 = sand.u32 (%p1446_p8), 1, %s1284_s27  }
  0x32   : > { %s917_s5 = smul.u32 (%p1446_p8), 12, %s1308_s10  ;;  %s1083_s6 = sshll.u32 (%p1446_p8), %s376_s18, 4 }
  0x33   : > { %s378_s30 = scalar_lea.vmem (%p1446_p8), [#allocation6], %s1083_s6 }
  0x34   : > { %s918_s21 = sadd.s32 (%p1446_p8), %s1304_s9, %s917_s5 }
  0x35   : > { %s1084_s13 = sshll.u32 (%p1446_p8), %s918_s21, 3 }
  0x36   : > { %s920_s22 = scalar_lea.vmem (%p1446_p8), %s1591_s1, %s1084_s13 }
  0x37   : > { %v1085_v2 = vld [vmem:[%s920_s22 + $0x10] sm:$0xff] (%p1446_p8)  ;;  %v1086_v3 = vld [vmem:[%s920_s22 + $0x40] sm:$0xff] (%p1446_p8) }
  0x38   : > { %417 = vst [vmem:[%s378_s30] sm:$0xff] %v1085_v2  ;;  %419 = vst [vmem:[%s378_s30 + $0x8] sm:$0xff] %v1086_v3 }
  0x39 PF: > { %425 = sbr.rel (!%p1465_p12) target bundleno = 65 (0x41), region = 112  ;;  %s427_s7 = sand.u32 (%p1465_p12), 1, %s1276_s25  }
  0x3a   : > { %s926_s19 = smul.u32 (%p1465_p12), 12, %s1308_s10  ;;  %s1087_s16 = sshll.u32 (%p1465_p12), %s427_s7, 4 }
  0x3b   : > { %s429_s6 = scalar_lea.vmem (%p1465_p12), [#allocation7], %s1087_s16 }
  0x3c   : > { %s927_s14 = sadd.s32 (%p1465_p12), %s1304_s9, %s926_s19 }
  0x3d   : > { %s1088_s18 = sshll.u32 (%p1465_p12), %s927_s14, 3 }
  0x3e   : > { %s929_s13 = scalar_lea.vmem (%p1465_p12), %s1592_s2, %s1088_s18 }
  0x3f   : > { %v1089_v4 = vld [vmem:[%s929_s13 + $0x20] sm:$0xff] (%p1465_p12)  ;;  %v1090_v5 = vld [vmem:[%s929_s13 + $0x50] sm:$0xff] (%p1465_p12) }
  0x40   : > { %468 = vst [vmem:[%s429_s6] sm:$0xff] %v1089_v4  ;;  %470 = vst [vmem:[%s429_s6 + $0x8] sm:$0xff] %v1090_v5 }
  0x41 PF: > { %p1091_p1 = scmp.ge.s32.totalorder %s1312_s11, 1  ;;  %p475_p2 = scmp.lt.s32.totalorder %s1312_s11, 5 }
  0x43   : > { %p476_p3 = pnand %p1091_p1, %p475_p2 }
  0x44   : > { %s489_s12 = sand.u32 (!%p476_p3), 1, %s1280_s26   ;;  %s482_s23 = sand.u32 (!%p476_p3), 1, %s1288_s28   ;;  %v1314_v6 = vmov (!%p476_p3), 0.0   ;;  %vm1315_vm0 = vmmov (!%p476_p3), 0   ;;  %v608_v11 = vld [vmem:[%s1593_s3] sm:$0xff] (!%p476_p3)  ;;  %v609_v17 = vld [vmem:[%s1593_s3 + $0x8] sm:$0xff] (!%p476_p3)  ;;  %v681_v38 = vlaneseq (!%p476_p3) }
  0x45   : > { %479 = sbr.rel (%p476_p3) target bundleno = 1014 (0x3f6), region = 150  ;;  %s1093_s21 = sshll.u32 (!%p476_p3), %s489_s12, 4  ;;  %1106 = vmatprep.subr.bf16.mxu0 (!%p476_p3), %v1314_v6  ;;  %1112 = vmatprep.subr.bf16.mxu1 (!%p476_p3), %v1314_v6  ;;  %v616_v12 = vld [vmem:[%s1594_s4] sm:$0xff] (!%p476_p3)  ;;  %v617_v25 = vld [vmem:[%s1594_s4 + $0x8] sm:$0xff] (!%p476_p3)  ;;  %vm589_vm1 = vcmask (!%p476_p3), 7168   ;;  %vm698_vm3 = vcmask (!%p476_p3), 130048  }
  0x46   : > { %s1508_s22 = sshll.u32 (!%p476_p3), %s482_s23, 4  ;;  %1108 = vmatprep.mubr.msk.bf16.mxu0 (!%p476_p3), %vm1315_vm0, %v1314_v6  ;;  %1114 = vmatprep.mubr.msk.bf16.mxu1 (!%p476_p3), %vm1315_vm0, %v1314_v6  ;;  %s491_s30 = scalar_lea.vmem (!%p476_p3), [#allocation6], %s1093_s21  ;;  %v1317_v37 = vmov (!%p476_p3), -1e+30   ;;  %592 = vst.msk [vmem:[#allocation3] sm:$0xff] (!%p476_p3), %vm589_vm1, %v1314_v6  ;;  %593 = vst.msk [vmem:[#allocation3 + $0x8] sm:$0xff] (!%p476_p3), %vm589_vm1, %v1314_v6 }
  0x47   : > { %v606_v7 = vld [vmem:[%s491_s30] sm:$0xff] (!%p476_p3)  ;;  %s1316_s7 = smov (!%p476_p3), 64   ;;  %s484_s19 = scalar_lea.vmem (!%p476_p3), [#allocation5], %s1508_s22  ;;  %v607_v9 = vld [vmem:[%s491_s30 + $0x8] sm:$0xff] (!%p476_p3)  ;;  %590 = vst.msk [vmem:[#allocation2] sm:$0xff] (!%p476_p3), %vm589_vm1, %v1317_v37  ;;  %591 = vst.msk [vmem:[#allocation2 + $0x8] sm:$0xff] (!%p476_p3), %vm589_vm1, %v1317_v37 }
  0x48   : > { %626 = vrot.lane.b32.xlu0 (!%p476_p3), %v606_v7, %s1316_s7  ;;  %v604_v8 = vld [vmem:[%s484_s19] sm:$0xff] (!%p476_p3)  ;;  %v605_v10 = vld [vmem:[%s484_s19 + $0x8] sm:$0xff] (!%p476_p3)  ;;  %s1615_s8 = sld [smem:[#allocation14_spill]] (!%p476_p3)  ;;  %s1617_s30 = sld [smem:[#allocation15_spill]] (!%p476_p3)  ;;  %v682_v39 = vshrl.u32 (!%p476_p3), %v681_v38, 7  ;;  %v689_v40 = vand.u32 (!%p476_p3), 127, %v681_v38 }
  0x49   : > { %612 = vrot.lane.b32.xlu1 (!%p476_p3), %v604_v8, %s1316_s7  ;;  %v610_v19 = vmul.f32 (!%p476_p3), %v608_v11, %v604_v8  ;;  %v611_v26 = vmul.f32 (!%p476_p3), %v609_v17, %v605_v10  ;;  %v1318_v52 = vmov (!%p476_p3), 0   ;;  %s496_s5 = sand.u32 (!%p476_p3), 1, %s1272_s24   ;;  %s553_s24 = scalar_lea.vmem (!%p476_p3), [#allocation8], %s1508_s22 }
  0x4a   : > { %v683_v41 = vadd.s32 (!%p476_p3), 8, %v682_v39  ;;  %vm692_vm2 = vcmp.le.s32.totalorder (!%p476_p3), %v689_v40, %v682_v39  ;;  %1212 = vset.pattern.permute.xlu0 (!%p476_p3), %v1318_v52  ;;  %1213 = vset.pattern.permute.xlu1 (!%p476_p3), %v1318_v52 }
  0x4c   : > { %628 = vrot.lane.b32.xlu0 %v607_v9, %s1316_s7  ;;  %vm693_vm4 = vcmp.le.s32.totalorder %v689_v40, %v683_v41  ;;  %s1619_s12 = sld [smem:[#allocation10_spill]] (%p1472_p13)  ;;  %s1620_s21 = sld [smem:[#allocation9_spill]] (%p1472_p13) }
  0x4d   : > { %614 = vrot.lane.b32.xlu1 %v605_v10, %s1316_s7  ;;  %s1621_s16 = sld [smem:[#allocation16_spill]] (%p1472_p13) }
  0x4e   : > { %s1616_s13 = smov %s1615_s8  ;;  %v622_v13 = vld [vmem:[%s1615_s8] sm:$0xff]  ;;  %s1618_s19 = smov %s1617_s30  ;;  %v697_v55 = vld [vmem:[#allocation2 + $0x8] sm:$0xff] }
  0x4f   : > { %v623_v14 = vld [vmem:[%s1616_s13 + $0x8] sm:$0xff]  ;;  %v630_v15 = vld [vmem:[%s1617_s30] sm:$0xff]  ;;  %v624_v22 = vmul.f32 %v622_v13, %v606_v7  ;;  %s1094_s8 = sshll.u32 %s496_s5, 4 }
  0x50   : > { %v631_v21 = vld [vmem:[%s1618_s19 + $0x8] sm:$0xff]  ;;  %v625_v23 = vmul.f32 %v623_v14, %v607_v9  ;;  %v696_v53 = vld [vmem:[#allocation2] sm:$0xff]  ;;  %s498_s6 = scalar_lea.vmem [#allocation7], %s1094_s8 }
  0x51   : > { %v759_v61 = vld [vmem:[%s498_s6] sm:$0xff]  ;;  %v760_v62 = vld [vmem:[%s498_s6 + $0x8] sm:$0xff] }
  0x52   : > { %v761_v63 = vpack.c.bf16 %v760_v62, %v759_v61  ;;  %s1098_s23 = sshll.u32 (%p1472_p13), %s1619_s12, 2 }
  0x53   : > { %s846_s30 = sadd.s32 (%p1472_p13), %s1620_s21, %s1098_s23 }
  0x54   : > { %1113 = vmatpush3.bf16.msra.mxu1 %v761_v63  ;;  %s1099_s7 = sshll.u32 (%p1472_p13), %s846_s30, 3 }
  0x55   : > { %s848_s14 = scalar_lea.vmem (%p1472_p13), %s1621_s16, %s1099_s7 }
  0xba   : > { %v627_v16 = vpop.permute.xlu0 %626 }
  0xbb   : > { %v613_v18 = vpop.permute.xlu1 %612  ;;  %v632_v24 = vmul.f32 %v630_v15, %v627_v16  ;;  %v729_v15 = vld [vmem:[#allocation3] sm:$0xff]  ;;  %v730_v16 = vld [vmem:[#allocation3 + $0x8] sm:$0xff] }
  0xbc   : > { %v618_v20 = vmul.f32 %v616_v12, %v613_v18 }
  0xbd   : > { %v634_v32 = vadd.f32 %v632_v24, %v624_v22 }
  0xbe   : > { %v629_v27 = vpop.permute.xlu0 %628  ;;  %v620_v30 = vadd.f32 %v618_v20, %v610_v19 }
  0xbf   : > { %v633_v28 = vmul.f32 %v631_v21, %v629_v27  ;;  %v615_v29 = vpop.permute.xlu1 %614 }
  0xc0   : > { %v619_v31 = vmul.f32 %v617_v25, %v615_v29 }
  0xc1   : > { %v635_v33 = vadd.f32 %v633_v28, %v625_v23 }
  0xc2   : > { %v621_v34 = vadd.f32 %v619_v31, %v611_v26 }
  0xc3   : > { %v637_v35 = vpack.c.bf16 %v635_v33, %v634_v32 }
  0xc4   : > { %v636_v36 = vpack.c.bf16 %v621_v34, %v620_v30 }
  0xc5   : > { %1107 = vmatpush3.bf16.xpose.msra.mxu0 %v637_v35 }
  0xcc   : > { %1109 = vmatmul.mubr.bf16.vlgmr.msra.gmra.mrb[0].mxu0 %v636_v36 }
 0x19f   : > { %v672_v42 = vpop.f32.mrb[0].mxu0 }
 0x1a0   : > { %v679_v43 = vmul.f32 0.088388346, %v672_v42  ;;  %v1110_v44 = vpop.f32.mrb[1].mxu0 }
 0x1a1   : > { %v675_v45 = vpop.f32.mrb[2].mxu0 }
 0x1a2   : > { %v680_v46 = vmul.f32 0.088388346, %v675_v45  ;;  %v1111_v47 = vpop.f32.mrb[3].mxu0  ;;  %v694_v48 = vsel %vm692_vm2, %v679_v43, -1e+30 }
 0x1a3   : > { %v699_v49 = vsel %vm698_vm3, %v694_v48, -inf }
 0x1a4   : > { %700 = vmax.xlane.f32.xlu0 %v699_v49  ;;  %v695_v50 = vsel %vm693_vm4, %v680_v46, -1e+30 }
 0x1a5   : > { %v702_v51 = vsel %vm698_vm3, %v695_v50, -inf }
 0x1a6   : > { %703 = vmax.xlane.f32.xlu1 %v702_v51 }
 0x231   : > { %v701_v54 = vpop.xlane.xlu0 %700 }
 0x232   : > { %v705_v56 = vmax.f32 %v696_v53, %v701_v54 }
 0x233   : > { %v704_v57 = vpop.xlane.xlu1 %703 }
 0x234   : > { %v707_v58 = vsub.f32 %v696_v53, %v705_v56  ;;  %810 = vst.msk [vmem:[#allocation2] sm:$0xff] %vm589_vm1, %v705_v56  ;;  %v706_v59 = vmax.f32 %v697_v55, %v704_v57  ;;  %715 = vperm.xlu0 %1212, %v705_v56  }
 0x236   : > { %v708_v60 = vsub.f32 %v697_v55, %v706_v59  ;;  %811 = vst.msk [vmem:[#allocation2 + $0x8] sm:$0xff] %vm589_vm1, %v706_v59  ;;  %720 = vperm.xlu1 %1213, %v706_v59   ;;  %v709_v11 = vmul.f32 1.442695, %v707_v58 }
 0x238   : > { %v711_v12 = vmul.f32 1.442695, %v708_v60 }
 0x2b3   : > { %v716_v0 = vpop.permute.xlu0 %715 }
 0x2b4   : > { %v723_v1 = vsub.f32 %v694_v48, %v716_v0 }
 0x2b5   : > { %v721_v2 = vpop.permute.xlu1 %720 }
 0x2b6   : > { %v725_v3 = vmul.f32 1.442695, %v723_v1  ;;  %v724_v4 = vsub.f32 %v695_v50, %v721_v2 }
 0x2b8   : > { %1214 = vpow2.f32 %v725_v3  ;;  %v727_v5 = vmul.f32 1.442695, %v724_v4 }
 0x2ba   : > { %1216 = vpow2.f32 %v727_v5 }
 0x2bb   : > { %1218 = vpow2.f32 %v709_v11 }
 0x2bc   : > { %1220 = vpow2.f32 %v711_v12 }
 0x2c2   : > { %v1215_v6 = vpop.eup %1214 }
 0x2c3   : > { %v733_v7 = vsel %vm698_vm3, %v1215_v6, 0.0 }
 0x2c4   : > { %v1217_v8 = vpop.eup %1216  ;;  %734 = vadd.xlane.f32.xlu1 %v733_v7 }
 0x2c5   : > { %v736_v9 = vsel %vm698_vm3, %v1217_v8, 0.0  ;;  %v758_v10 = vpack.c.bf16 %v1217_v8, %v1215_v6  ;;  %v1219_v13 = vpop.eup %1218 }
 0x2c6   : > { %737 = vadd.xlane.f32.xlu0 %v736_v9  ;;  %v1221_v14 = vpop.eup %1220  ;;  %v731_v17 = vmul.f32 %v1219_v13, %v729_v15 }
 0x2c7   : > { %1115 = vmatmul.mubr.msk.bf16.vlgmr.msra.gmra.mrb[0].mxu1 %vm698_vm3, %v758_v10  ;;  %v732_v20 = vmul.f32 %v1221_v14, %v730_v16 }
 0x2d5   : > { %748 = vperm.xlu1 %1213, %v1219_v13  }
 0x2dc   : > { %753 = vperm.xlu0 %1212, %v1221_v14  }
 0x351   : > { %v735_v18 = vpop.xlane.xlu1 %734 }
 0x352   : > { %v739_v19 = vadd.f32 %v735_v18, %v731_v17 }
 0x353   : > { %v738_v21 = vpop.xlane.xlu0 %737 }
 0x354   : > { %742 = vst.msk [vmem:[#allocation3] sm:$0xff] %vm589_vm1, %v739_v19  ;;  %v740_v22 = vadd.f32 %v738_v21, %v732_v20 }
 0x355   : > { %v749_v31 = vpop.permute.xlu1 %748 }
 0x356   : > { %743 = vst.msk [vmem:[#allocation3 + $0x8] sm:$0xff] %vm589_vm1, %v740_v22  ;;  %v756_v32 = vmul.f32 0.0, %v749_v31 }
 0x35b   : > { %v815_v23 = vld [vmem:[#allocation3] sm:$0xff]  ;;  %v754_v33 = vpop.permute.xlu0 %753 }
 0x35c   : > { %1222 = vrcp.f32 %v815_v23  ;;  %v757_v36 = vmul.f32 0.0, %v754_v33 }
 0x35d   : > { %v816_v24 = vld [vmem:[#allocation3 + $0x8] sm:$0xff] }
 0x35e   : > { %1224 = vrcp.f32 %v816_v24 }
 0x366   : > { %v1223_v25 = vpop.eup %1222 }
 0x367   : > { %823 = vperm.xlu1 %1213, %v1223_v25  }
 0x368   : > { %v1225_v26 = vpop.eup %1224 }
 0x36b   : > { %828 = vperm.xlu1 %1213, %v1225_v26  }
 0x39a   : > { %v799_v27 = vpop.f32.mrb[0].mxu1 }
 0x39b   : > { %v1116_v28 = vpop.f32.mrb[1].mxu1  ;;  %v806_v34 = vadd.f32 %v799_v27, %v756_v32 }
 0x39c   : > { %v802_v29 = vpop.f32.mrb[2].mxu1 }
 0x39d   : > { %v1117_v30 = vpop.f32.mrb[3].mxu1  ;;  %v807_v38 = vadd.f32 %v802_v29, %v757_v36 }
 0x3e6   : > { %v824_v35 = vpop.permute.xlu1 %823 }
 0x3e7   : > { %v831_v37 = vmul.f32 %v824_v35, %v806_v34  ;;  %841 = sbr.rel (!%p1472_p13) target bundleno = 1014 (0x3f6), region = 178 }
 0x3e9   : > { %833 = vst [vmem:[%s553_s24] sm:$0xff] %v831_v37 }
 0x3ea   : > { %v829_v39 = vpop.permute.xlu1 %828 }
 0x3eb   : > { %v832_v40 = vmul.f32 %v829_v39, %v807_v38 }
 0x3ed   : > { %834 = vst [vmem:[%s553_s24 + $0x8] sm:$0xff] %v832_v40 }
 0x3f0   : > { %v878_v41 = vld [vmem:[%s553_s24] sm:$0xff] }
 0x3f1   : > { %879 = vst [vmem:[%s848_s14] sm:$0xff] %v878_v41 }
 0x3f4   : > { %v880_v42 = vld [vmem:[%s553_s24 + $0x8] sm:$0xff] }
 0x3f5   : > { %881 = vst [vmem:[%s848_s14 + $0x10] sm:$0xff] %v880_v42 }
 0x3f6 PF: > { %s17_s11 = sadd.s32 1, %s1312_s11   ;;  %s1622_s20 = sld [smem:[#allocation13_spill]] }
 0x3f7   : > { %p14_p4 = scmp.ge.s32.totalorder %s17_s11, 6   ;;  %s1623_s22 = sld [smem:[#allocation11_spill]] }
 0x3f8   : > { %s1624_s18 = sld [smem:[#allocation12_spill]]  ;;  %s1625_s24 = smov %s1276_s25 }
 0x3f9   : > { %s1626_s25 = smov %s1477_s15  ;;  %s1627_s26 = smov %s1284_s27 }
 0x3fa   : > { %s1628_s27 = smov %s1455_s17  ;;  %s1629_s28 = smov %s1292_s29 }
 0x3fb   : > { %s1631_s30 = smov %s1304_s9  ;;  %s1632_s8 = smov %s1308_s10 }
 0x3fc   : > { %s1630_s29 = smov %s1622_s20  ;;  %16 = sbr.rel (!%p14_p4) target bundleno = 10 (0xa), region = 275 }
 0x3fd   : > { %s1633_s9 = smov %s1623_s22 }
 0x3fe   : > { %s1634_s10 = smov %s1624_s18 }

// kernel: block_forward.4
= control target key start
LH: loop header
LB: loop body
LE: loop exit
PB: predicated region body
PF: predicated region fallthrough
CT: control target
= control target key end

     0   :  { %s1556_s0 = inlined_call_operand.vmem [shape: f32[32,256], index: 0, kind: input, shape index: {}]   ;;  %s1557_s1 = inlined_call_operand.vmem [shape: bf16[256,768], index: 1, kind: input, shape index: {}]   ;;  %s1558_s2 = inlined_call_operand.vmem [shape: f32[32,768], index: 2, kind: output, shape index: {}]  }
   0x1   :  { %v1125_v0 = vld [vmem:[%s1556_s0] sm:$0xff]  ;;  %v1130_v1 = vld [vmem:[%s1556_s0 + $0x8] sm:$0xff]  ;;  %v1135_v2 = vld [vmem:[%s1556_s0 + $0x10] sm:$0xff] }
   0x2   :  { %v19_v3 = vmul.f32 %v1125_v0, %v1125_v0  ;;  %v20_v4 = vmul.f32 %v1130_v1, %v1130_v1  ;;  %v1144_v5 = vld [vmem:[%s1556_s0 + $0x18] sm:$0xff]  ;;  %v21_v6 = vmul.f32 %v1135_v2, %v1135_v2  ;;  %v1151_v7 = vld [vmem:[%s1556_s0 + $0x20] sm:$0xff]  ;;  %v1156_v8 = vld [vmem:[%s1556_s0 + $0x28] sm:$0xff] }
   0x3   :  { %v22_v9 = vmul.f32 %v1144_v5, %v1144_v5  ;;  %v23_v10 = vmul.f32 %v1151_v7, %v1151_v7  ;;  %v24_v11 = vmul.f32 %v1156_v8, %v1156_v8  ;;  %v1167_v12 = vld [vmem:[%s1556_s0 + $0x30] sm:$0xff]  ;;  %v1172_v13 = vld [vmem:[%s1556_s0 + $0x38] sm:$0xff]  ;;  %v957_v19 = vld [vmem:[%s1557_s1 + $0xc] ss:$24 sps:$4 sm:$0xff]  }
   0x4   :  { %v27_v14 = vadd.f32 %v20_v4, %v19_v3  ;;  %v25_v15 = vmul.f32 %v1167_v12, %v1167_v12  ;;  %v26_v16 = vmul.f32 %v1172_v13, %v1172_v13  ;;  %v955_v17 = vld [vmem:[%s1557_s1 + $0x4] ss:$24 sps:$4 sm:$0xff]   ;;  %v959_v20 = vld [vmem:[%s1557_s1] ss:$24 sps:$4 sm:$0xff]   ;;  %693 = vmatprep.subr.bf16.mxu1 %v957_v19  ;;  %v961_v24 = vld [vmem:[%s1557_s1 + $0x34] ss:$24 sps:$4 sm:$0xff]  }
   0x5   :  { %v33_v18 = vadd.f32 %v24_v11, %v23_v10  ;;  %v30_v21 = vadd.f32 %v22_v9, %v21_v6  ;;  %640 = vmatprep.subr.bf16.mxu0 %v955_v17  ;;  %v960_v22 = vld [vmem:[%s1557_s1 + $0x8] ss:$24 sps:$4 sm:$0xff]   ;;  %v963_v25 = vld [vmem:[%s1557_s1 + $0x3c] ss:$24 sps:$4 sm:$0xff]   ;;  %v966_v27 = vld [vmem:[%s1557_s1 + $0x38] ss:$24 sps:$4 sm:$0xff]  }
   0x6   :  { %28 = vadd.xlane.f32.xlu0 %v27_v14  ;;  %v36_v23 = vadd.f32 %v26_v16, %v25_v15  ;;  %641 = vmatpush1.bf16.msra.mxu0 %v959_v20  ;;  %v965_v26 = vld [vmem:[%s1557_s1 + $0x30] ss:$24 sps:$4 sm:$0xff]   ;;  %v967_v28 = vld [vmem:[%s1557_s1 + $0x64] ss:$24 sps:$4 sm:$0xff]   ;;  %v971_v30 = vld [vmem:[%s1557_s1 + $0x60] ss:$24 sps:$4 sm:$0xff]  }
   0x7   :  { %34 = vadd.xlane.f32.xlu1 %v33_v18  ;;  %694 = vmatpush1.bf16.msra.mxu1 %v960_v22  ;;  %v969_v29 = vld [vmem:[%s1557_s1 + $0x6c] ss:$24 sps:$4 sm:$0xff]   ;;  %v972_v31 = vld [vmem:[%s1557_s1 + $0x68] ss:$24 sps:$4 sm:$0xff]   ;;  %v975_v33 = vld [vmem:[%s1557_s1 + $0x9c] ss:$24 sps:$4 sm:$0xff]  }
   0x8   :  { %642 = vmatprep.subr.bf16.mxu0 %v961_v24  ;;  %695 = vmatprep.subr.bf16.mxu1 %v963_v25  ;;  %v973_v32 = vld [vmem:[%s1557_s1 + $0x94] ss:$24 sps:$4 sm:$0xff]   ;;  %v977_v34 = vld [vmem:[%s1557_s1 + $0x90] ss:$24 sps:$4 sm:$0xff]   ;;  %v979_v36 = vld [vmem:[%s1557_s1 + $0xc4] ss:$24 sps:$4 sm:$0xff]  }
   0x9   :  { %v978_v35 = vld [vmem:[%s1557_s1 + $0x98] ss:$24 sps:$4 sm:$0xff]   ;;  %v981_v37 = vld [vmem:[%s1557_s1 + $0xcc] ss:$24 sps:$4 sm:$0xff]   ;;  %v984_v39 = vld [vmem:[%s1557_s1 + $0xc8] ss:$24 sps:$4 sm:$0xff]  }
   0xa   :  { %31 = vadd.xlane.f32.xlu0 %v30_v21  ;;  %643 = vmatpush1.bf16.msra.mxu0 %v965_v26  ;;  %v983_v38 = vld [vmem:[%s1557_s1 + $0xc0] ss:$24 sps:$4 sm:$0xff]   ;;  %v985_v40 = vld [vmem:[%s1557_s1 + $0xf4] ss:$24 sps:$4 sm:$0xff]   ;;  %v989_v42 = vld [vmem:[%s1557_s1 + $0xf0] ss:$24 sps:$4 sm:$0xff]  }
   0xb   :  { %37 = vadd.xlane.f32.xlu1 %v36_v23  ;;  %696 = vmatpush1.bf16.msra.mxu1 %v966_v27  ;;  %v987_v41 = vld [vmem:[%s1557_s1 + $0xfc] ss:$24 sps:$4 sm:$0xff]   ;;  %v990_v43 = vld [vmem:[%s1557_s1 + $0xf8] ss:$24 sps:$4 sm:$0xff]   ;;  %v993_v45 = vld [vmem:[%s1557_s1 + $0x12c] ss:$24 sps:$4 sm:$0xff]  }
   0xc   :  { %644 = vmatprep.subr.bf16.mxu0 %v967_v28  ;;  %697 = vmatprep.subr.bf16.mxu1 %v969_v29  ;;  %v991_v44 = vld [vmem:[%s1557_s1 + $0x124] ss:$24 sps:$4 sm:$0xff]   ;;  %v995_v46 = vld [vmem:[%s1557_s1 + $0x120] ss:$24 sps:$4 sm:$0xff]   ;;  %v997_v48 = vld [vmem:[%s1557_s1 + $0x154] ss:$24 sps:$4 sm:$0xff]  }
   0xd   :  { %v996_v47 = vld [vmem:[%s1557_s1 + $0x128] ss:$24 sps:$4 sm:$0xff]   ;;  %v999_v49 = vld [vmem:[%s1557_s1 + $0x15c] ss:$24 sps:$4 sm:$0xff]   ;;  %v1002_v51 = vld [vmem:[%s1557_s1 + $0x158] ss:$24 sps:$4 sm:$0xff]  }
   0xe   :  { %645 = vmatpush1.bf16.msra.mxu0 %v971_v30  ;;  %v1001_v50 = vld [vmem:[%s1557_s1 + $0x150] ss:$24 sps:$4 sm:$0xff]   ;;  %v1003_v52 = vld [vmem:[%s1557_s1 + $0x184] ss:$24 sps:$4 sm:$0xff]   ;;  %v1007_v54 = vld [vmem:[%s1557_s1 + $0x180] ss:$24 sps:$4 sm:$0xff]  }
   0xf   :  { %698 = vmatpush1.bf16.msra.mxu1 %v972_v31  ;;  %646 = vmatprep.subr.bf16.mxu0 %v973_v32  ;;  %v1005_v53 = vld [vmem:[%s1557_s1 + $0x18c] ss:$24 sps:$4 sm:$0xff]   ;;  %v1008_v55 = vld [vmem:[%s1557_s1 + $0x188] ss:$24 sps:$4 sm:$0xff]   ;;  %v1011_v57 = vld [vmem:[%s1557_s1 + $0x1bc] ss:$24 sps:$4 sm:$0xff]  }
  0x10   :  { %699 = vmatprep.subr.bf16.mxu1 %v975_v33  ;;  %v1009_v56 = vld [vmem:[%s1557_s1 + $0x1b4] ss:$24 sps:$4 sm:$0xff]   ;;  %v1013_v58 = vld [vmem:[%s1557_s1 + $0x1b0] ss:$24 sps:$4 sm:$0xff]   ;;  %v1015_v60 = vld [vmem:[%s1557_s1 + $0x1e4] ss:$24 sps:$4 sm:$0xff]  }
  0x11   :  { %v1014_v59 = vld [vmem:[%s1557_s1 + $0x1b8] ss:$24 sps:$4 sm:$0xff]   ;;  %v1017_v61 = vld [vmem:[%s1557_s1 + $0x1ec] ss:$24 sps:$4 sm:$0xff]   ;;  %v1020_v63 = vld [vmem:[%s1557_s1 + $0x1e8] ss:$24 sps:$4 sm:$0xff]  }
  0x12   :  { %647 = vmatpush1.bf16.msra.mxu0 %v977_v34  ;;  %v1019_v62 = vld [vmem:[%s1557_s1 + $0x1e0] ss:$24 sps:$4 sm:$0xff]   ;;  %v1021_v3 = vld [vmem:[%s1557_s1 + $0x214] ss:$24 sps:$4 sm:$0xff]   ;;  %v1025_v6 = vld [vmem:[%s1557_s1 + $0x210] ss:$24 sps:$4 sm:$0xff]  }
  0x13   :  { %700 = vmatpush1.bf16.msra.mxu1 %v978_v35  ;;  %648 = vmatprep.subr.bf16.mxu0 %v979_v36  ;;  %v1023_v4 = vld [vmem:[%s1557_s1 + $0x21c] ss:$24 sps:$4 sm:$0xff]   ;;  %v1026_v9 = vld [vmem:[%s1557_s1 + $0x218] ss:$24 sps:$4 sm:$0xff]   ;;  %v1029_v11 = vld [vmem:[%s1557_s1 + $0x24c] ss:$24 sps:$4 sm:$0xff]  }
  0x14   :  { %701 = vmatprep.subr.bf16.mxu1 %v981_v37  ;;  %v1027_v10 = vld [vmem:[%s1557_s1 + $0x244] ss:$24 sps:$4 sm:$0xff]   ;;  %v1031_v14 = vld [vmem:[%s1557_s1 + $0x240] ss:$24 sps:$4 sm:$0xff]   ;;  %v1033_v16 = vld [vmem:[%s1557_s1 + $0x274] ss:$24 sps:$4 sm:$0xff]  }
  0x15   :  { %v1032_v15 = vld [vmem:[%s1557_s1 + $0x248] ss:$24 sps:$4 sm:$0xff]   ;;  %v1035_v17 = vld [vmem:[%s1557_s1 + $0x27c] ss:$24 sps:$4 sm:$0xff]   ;;  %v1038_v19 = vld [vmem:[%s1557_s1 + $0x278] ss:$24 sps:$4 sm:$0xff]  }
  0x16   :  { %649 = vmatpush1.bf16.msra.mxu0 %v983_v38  ;;  %v1037_v18 = vld [vmem:[%s1557_s1 + $0x270] ss:$24 sps:$4 sm:$0xff]   ;;  %v1039_v20 = vld [vmem:[%s1557_s1 + $0x2a4] ss:$24 sps:$4 sm:$0xff]   ;;  %v1043_v22 = vld [vmem:[%s1557_s1 + $0x2a0] ss:$24 sps:$4 sm:$0xff]  }
  0x17   :  { %702 = vmatpush1.bf16.msra.mxu1 %v984_v39  ;;  %650 = vmatprep.subr.bf16.mxu0 %v985_v40  ;;  %v1041_v21 = vld [vmem:[%s1557_s1 + $0x2ac] ss:$24 sps:$4 sm:$0xff]   ;;  %v1044_v23 = vld [vmem:[%s1557_s1 + $0x2a8] ss:$24 sps:$4 sm:$0xff]   ;;  %v1047_v25 = vld [vmem:[%s1557_s1 + $0x2dc] ss:$24 sps:$4 sm:$0xff]  }
  0x18   :  { %703 = vmatprep.subr.bf16.mxu1 %v987_v41  ;;  %v1045_v24 = vld [vmem:[%s1557_s1 + $0x2d4] ss:$24 sps:$4 sm:$0xff]   ;;  %v1049_v26 = vld [vmem:[%s1557_s1 + $0x2d0] ss:$24 sps:$4 sm:$0xff]  }
  0x19   :  { %v1050_v27 = vld [vmem:[%s1557_s1 + $0x2d8] ss:$24 sps:$4 sm:$0xff]   ;;  %v1053_v28 = vld [vmem:[%s1557_s1 + $0x14] ss:$24 sps:$4 sm:$0xff]  }
  0x1a   :  { %651 = vmatpush1.bf16.msra.mxu0 %v989_v42 }
  0x1b   :  { %704 = vmatpush1.bf16.msra.mxu1 %v990_v43  ;;  %652 = vmatprep.subr.bf16.mxu0 %v991_v44 }
  0x1c   :  { %705 = vmatprep.subr.bf16.mxu1 %v993_v45 }
  0x1e   :  { %653 = vmatpush1.bf16.msra.mxu0 %v995_v46 }
  0x1f   :  { %706 = vmatpush1.bf16.msra.mxu1 %v996_v47  ;;  %654 = vmatprep.subr.bf16.mxu0 %v997_v48 }
  0x20   :  { %707 = vmatprep.subr.bf16.mxu1 %v999_v49 }
  0x22   :  { %655 = vmatpush1.bf16.msra.mxu0 %v1001_v50 }
  0x23   :  { %708 = vmatpush1.bf16.msra.mxu1 %v1002_v51  ;;  %656 = vmatprep.subr.bf16.mxu0 %v1003_v52  ;;  %v1051_v52 = vld [vmem:[%s1557_s1 + $0x10] ss:$24 sps:$4 sm:$0xff]  }
  0x24   :  { %709 = vmatprep.subr.bf16.mxu1 %v1005_v53 }
  0x26   :  { %657 = vmatpush1.bf16.msra.mxu0 %v1007_v54 }
  0x27   :  { %710 = vmatpush1.bf16.msra.mxu1 %v1008_v55  ;;  %658 = vmatprep.subr.bf16.mxu0 %v1009_v56  ;;  %v1060_v55 = vld [vmem:[%s1557_s1 + $0xa0] ss:$24 sps:$4 sm:$0xff]   ;;  %v1065_v56 = vld [vmem:[%s1557_s1 + $0xd4] ss:$24 sps:$4 sm:$0xff]  }
  0x28   :  { %711 = vmatprep.subr.bf16.mxu1 %v1011_v57  ;;  %v1063_v57 = vld [vmem:[%s1557_s1 + $0xd0] ss:$24 sps:$4 sm:$0xff]  }
  0x2a   :  { %659 = vmatpush1.bf16.msra.mxu0 %v1013_v58  ;;  %v1068_v58 = vld [vmem:[%s1557_s1 + $0x104] ss:$24 sps:$4 sm:$0xff]  }
  0x2b   :  { %712 = vmatpush1.bf16.msra.mxu1 %v1014_v59  ;;  %660 = vmatprep.subr.bf16.mxu0 %v1015_v60  ;;  %v1066_v59 = vld [vmem:[%s1557_s1 + $0x100] ss:$24 sps:$4 sm:$0xff]   ;;  %v1071_v60 = vld [vmem:[%s1557_s1 + $0x134] ss:$24 sps:$4 sm:$0xff]  }
  0x2c   :  { %713 = vmatprep.subr.bf16.mxu1 %v1017_v61  ;;  %v1069_v61 = vld [vmem:[%s1557_s1 + $0x130] ss:$24 sps:$4 sm:$0xff]  }
  0x2e   :  { %661 = vmatpush1.bf16.msra.mxu0 %v1019_v62  ;;  %v1074_v62 = vld [vmem:[%s1557_s1 + $0x164] ss:$24 sps:$4 sm:$0xff]  }
  0x2f   :  { %714 = vmatpush1.bf16.msra.mxu1 %v1020_v63  ;;  %662 = vmatprep.subr.bf16.mxu0 %v1021_v3  ;;  %v1072_v63 = vld [vmem:[%s1557_s1 + $0x160] ss:$24 sps:$4 sm:$0xff]   ;;  %v1077_v3 = vld [vmem:[%s1557_s1 + $0x194] ss:$24 sps:$4 sm:$0xff]  }
  0x30   :  { %715 = vmatprep.subr.bf16.mxu1 %v1023_v4  ;;  %v1075_v4 = vld [vmem:[%s1557_s1 + $0x190] ss:$24 sps:$4 sm:$0xff]  }
  0x32   :  { %663 = vmatpush1.bf16.msra.mxu0 %v1025_v6  ;;  %v1080_v6 = vld [vmem:[%s1557_s1 + $0x1c4] ss:$24 sps:$4 sm:$0xff]  }
  0x33   :  { %716 = vmatpush1.bf16.msra.mxu1 %v1026_v9  ;;  %664 = vmatprep.subr.bf16.mxu0 %v1027_v10  ;;  %v1078_v9 = vld [vmem:[%s1557_s1 + $0x1c0] ss:$24 sps:$4 sm:$0xff]   ;;  %v1083_v10 = vld [vmem:[%s1557_s1 + $0x1f4] ss:$24 sps:$4 sm:$0xff]  }
  0x34   :  { %717 = vmatprep.subr.bf16.mxu1 %v1029_v11  ;;  %v1081_v11 = vld [vmem:[%s1557_s1 + $0x1f0] ss:$24 sps:$4 sm:$0xff]  }
  0x36   :  { %665 = vmatpush1.bf16.msra.mxu0 %v1031_v14  ;;  %v1086_v14 = vld [vmem:[%s1557_s1 + $0x224] ss:$24 sps:$4 sm:$0xff]  }
  0x37   :  { %718 = vmatpush1.bf16.msra.mxu1 %v1032_v15  ;;  %666 = vmatprep.subr.bf16.mxu0 %v1033_v16  ;;  %v1084_v15 = vld [vmem:[%s1557_s1 + $0x220] ss:$24 sps:$4 sm:$0xff]   ;;  %v1089_v16 = vld [vmem:[%s1557_s1 + $0x254] ss:$24 sps:$4 sm:$0xff]  }
  0x38   :  { %719 = vmatprep.subr.bf16.mxu1 %v1035_v17  ;;  %v1087_v17 = vld [vmem:[%s1557_s1 + $0x250] ss:$24 sps:$4 sm:$0xff]  }
  0x3a   :  { %667 = vmatpush1.bf16.msra.mxu0 %v1037_v18  ;;  %v1092_v18 = vld [vmem:[%s1557_s1 + $0x284] ss:$24 sps:$4 sm:$0xff]  }
  0x3b   :  { %720 = vmatpush1.bf16.msra.mxu1 %v1038_v19  ;;  %668 = vmatprep.subr.bf16.mxu0 %v1039_v20  ;;  %v1090_v19 = vld [vmem:[%s1557_s1 + $0x280] ss:$24 sps:$4 sm:$0xff]   ;;  %v1095_v20 = vld [vmem:[%s1557_s1 + $0x2b4] ss:$24 sps:$4 sm:$0xff]  }
  0x3c   :  { %721 = vmatprep.subr.bf16.mxu1 %v1041_v21  ;;  %v1093_v21 = vld [vmem:[%s1557_s1 + $0x2b0] ss:$24 sps:$4 sm:$0xff]  }
  0x3e   :  { %669 = vmatpush1.bf16.msra.mxu0 %v1043_v22  ;;  %v1098_v22 = vld [vmem:[%s1557_s1 + $0x2e4] ss:$24 sps:$4 sm:$0xff]  }
  0x3f   :  { %722 = vmatpush1.bf16.msra.mxu1 %v1044_v23  ;;  %670 = vmatprep.subr.bf16.mxu0 %v1045_v24  ;;  %v1096_v23 = vld [vmem:[%s1557_s1 + $0x2e0] ss:$24 sps:$4 sm:$0xff]  }
  0x40   :  { %723 = vmatprep.subr.bf16.mxu1 %v1047_v25 }
  0x42   :  { %671 = vmatpush1.bf16.msra.mxu0 %v1049_v26 }
  0x43   :  { %724 = vmatpush1.bf16.msra.mxu1 %v1050_v27  ;;  %746 = vmatprep.subr.bf16.mxu0 %v1053_v28 }
  0x44   :  { %923 = vmatprep.subr.bf16.mxu1 %v1053_v28 }
  0x93   :  { %v29_v29 = vpop.xlane.xlu0 %28 }
  0x94   :  { %v40_v30 = vmul.f32 0.00390625, %v29_v29  ;;  %v35_v31 = vpop.xlane.xlu1 %34 }
  0x95   :  { %v42_v32 = vmul.f32 0.00390625, %v35_v31 }
  0x96   :  { %v44_v33 = vadd.f32 1e-06, %v40_v30 }
  0x97   :  { %v32_v34 = vpop.xlane.xlu0 %31  ;;  %v46_v35 = vadd.f32 1e-06, %v42_v32 }
  0x98   :  { %v41_v36 = vmul.f32 0.00390625, %v32_v34  ;;  %v38_v37 = vpop.xlane.xlu1 %37  ;;  %1099 = vrsqrt.f32 %v44_v33 }
  0x99   :  { %v43_v38 = vmul.f32 0.00390625, %v38_v37  ;;  %1101 = vrsqrt.f32 %v46_v35 }
  0x9a   :  { %v45_v39 = vadd.f32 1e-06, %v41_v36 }
  0x9b   :  { %v47_v40 = vadd.f32 1e-06, %v43_v38 }
  0x9c   :  { %1103 = vrsqrt.f32 %v45_v39 }
  0x9d   :  { %1105 = vrsqrt.f32 %v47_v40 }
  0xa2   :  { %v1100_v41 = vpop.eup %1099 }
  0xa3   :  { %v1102_v42 = vpop.eup %1101  ;;  %v53_v44 = vmul.f32 %v1100_v41, %v1130_v1  ;;  %v52_v47 = vmul.f32 %v1100_v41, %v1125_v0  ;;  %v1056_v1 = vld [vmem:[%s1557_s1 + $0x44] ss:$24 sps:$4 sm:$0xff]  }
  0xa4   :  { %v57_v49 = vmul.f32 %v1102_v42, %v1156_v8  ;;  %v1054_v8 = vld [vmem:[%s1557_s1 + $0x40] ss:$24 sps:$4 sm:$0xff]  }
  0xa6   :  { %v1104_v43 = vpop.eup %1103 }
  0xa7   :  { %v1106_v45 = vpop.eup %1105  ;;  %v55_v46 = vmul.f32 %v1104_v43, %v1144_v5  ;;  %v54_v48 = vmul.f32 %v1104_v43, %v1135_v2  ;;  %v56_v2 = vmul.f32 %v1102_v42, %v1151_v7  ;;  %v1057_v7 = vld [vmem:[%s1557_s1 + $0x70] ss:$24 sps:$4 sm:$0xff]  }
  0xa8   :  { %v59_v50 = vmul.f32 %v1106_v45, %v1172_v13  ;;  %v58_v5 = vmul.f32 %v1106_v45, %v1167_v12  ;;  %v1059_v13 = vld [vmem:[%s1557_s1 + $0x74] ss:$24 sps:$4 sm:$0xff]   ;;  %v1062_v12 = vld [vmem:[%s1557_s1 + $0xa4] ss:$24 sps:$4 sm:$0xff]  }
  0xa9   :  { %v61_v51 = vpack.c.bf16 %v55_v46, %v53_v44  ;;  %v1382_v53 = vpack.c.bf16 %v54_v48, %v52_v47 }
  0xaa   :  { %v63_v0 = vpack.c.bf16 %v59_v50, %v57_v49  ;;  %v1397_v54 = vpack.c.bf16 %v58_v5, %v56_v2 }
  0xab   :  { %672 = vmatprep.mubr.bf16.mxu0 %v61_v51  ;;  %725 = vmatprep.mubr.bf16.mxu1 %v61_v51 }
  0xac   :  { %673 = vmatmul.mubr.bf16.vlgmr.msra.gmra.mrb[0].mxu0 %v1382_v53  ;;  %726 = vmatmul.mubr.bf16.vlgmr.msra.gmra.mrb[0].mxu1 %v1382_v53 }
  0xad   :  { %747 = vmatpush1.bf16.msra.mxu0 %v1051_v52  ;;  %939 = vmatpush1.bf16.msra.mxu1 %v1051_v52 }
  0xae   :  { %748 = vmatprep.subr.bf16.mxu0 %v1056_v1  ;;  %924 = vmatprep.subr.bf16.mxu1 %v1056_v1 }
  0xaf   :  { %682 = vmatprep.mubr.bf16.mxu0 %v63_v0  ;;  %735 = vmatprep.mubr.bf16.mxu1 %v63_v0 }
  0xb1   :  { %749 = vmatpush1.bf16.msra.mxu0 %v1054_v8  ;;  %940 = vmatpush1.bf16.msra.mxu1 %v1054_v8 }
  0xb2   :  { %750 = vmatprep.subr.bf16.mxu0 %v1059_v13  ;;  %925 = vmatprep.subr.bf16.mxu1 %v1059_v13 }
  0xb4   :  { %683 = vmatmul.mubr.bf16.gmra.mrb[4].mxu0 %v1397_v54  ;;  %736 = vmatmul.mubr.bf16.gmra.mrb[4].mxu1 %v1397_v54 }
  0xb5   :  { %751 = vmatpush1.bf16.msra.mxu0 %v1057_v7  ;;  %941 = vmatpush1.bf16.msra.mxu1 %v1057_v7 }
  0xb6   :  { %778 = vmatprep.mubr.bf16.mxu0 %v61_v51  ;;  %752 = vmatprep.subr.bf16.mxu0 %v1062_v12 }
  0xb7   :  { %926 = vmatprep.subr.bf16.mxu1 %v1062_v12  ;;  %788 = vmatprep.mubr.bf16.mxu1 %v63_v0 }
  0xb9   :  { %753 = vmatpush1.bf16.msra.mxu0 %v1060_v55  ;;  %942 = vmatpush1.bf16.msra.mxu1 %v1060_v55 }
  0xba   :  { %754 = vmatprep.subr.bf16.mxu0 %v1065_v56  ;;  %927 = vmatprep.subr.bf16.mxu1 %v1065_v56 }
  0xbd   :  { %755 = vmatpush1.bf16.msra.mxu0 %v1063_v57  ;;  %943 = vmatpush1.bf16.msra.mxu1 %v1063_v57 }
  0xbe   :  { %756 = vmatprep.subr.bf16.mxu0 %v1068_v58  ;;  %928 = vmatprep.subr.bf16.mxu1 %v1068_v58 }
  0xc1   :  { %757 = vmatpush1.bf16.msra.mxu0 %v1066_v59  ;;  %944 = vmatpush1.bf16.msra.mxu1 %v1066_v59 }
  0xc2   :  { %758 = vmatprep.subr.bf16.mxu0 %v1071_v60  ;;  %929 = vmatprep.subr.bf16.mxu1 %v1071_v60 }
  0xc5   :  { %759 = vmatpush1.bf16.msra.mxu0 %v1069_v61  ;;  %945 = vmatpush1.bf16.msra.mxu1 %v1069_v61 }
  0xc6   :  { %760 = vmatprep.subr.bf16.mxu0 %v1074_v62  ;;  %930 = vmatprep.subr.bf16.mxu1 %v1074_v62 }
  0xc9   :  { %761 = vmatpush1.bf16.msra.mxu0 %v1072_v63  ;;  %946 = vmatpush1.bf16.msra.mxu1 %v1072_v63 }
  0xca   :  { %762 = vmatprep.subr.bf16.mxu0 %v1077_v3  ;;  %931 = vmatprep.subr.bf16.mxu1 %v1077_v3 }
  0xcd   :  { %763 = vmatpush1.bf16.msra.mxu0 %v1075_v4  ;;  %947 = vmatpush1.bf16.msra.mxu1 %v1075_v4 }
  0xce   :  { %764 = vmatprep.subr.bf16.mxu0 %v1080_v6  ;;  %932 = vmatprep.subr.bf16.mxu1 %v1080_v6 }
  0xd1   :  { %765 = vmatpush1.bf16.msra.mxu0 %v1078_v9  ;;  %948 = vmatpush1.bf16.msra.mxu1 %v1078_v9 }
  0xd2   :  { %766 = vmatprep.subr.bf16.mxu0 %v1083_v10  ;;  %933 = vmatprep.subr.bf16.mxu1 %v1083_v10 }
  0xd5   :  { %767 = vmatpush1.bf16.msra.mxu0 %v1081_v11  ;;  %949 = vmatpush1.bf16.msra.mxu1 %v1081_v11 }
  0xd6   :  { %768 = vmatprep.subr.bf16.mxu0 %v1086_v14  ;;  %934 = vmatprep.subr.bf16.mxu1 %v1086_v14 }
  0xd9   :  { %769 = vmatpush1.bf16.msra.mxu0 %v1084_v15  ;;  %950 = vmatpush1.bf16.msra.mxu1 %v1084_v15 }
  0xda   :  { %770 = vmatprep.subr.bf16.mxu0 %v1089_v16  ;;  %935 = vmatprep.subr.bf16.mxu1 %v1089_v16 }
  0xdd   :  { %771 = vmatpush1.bf16.msra.mxu0 %v1087_v17  ;;  %951 = vmatpush1.bf16.msra.mxu1 %v1087_v17 }
  0xde   :  { %772 = vmatprep.subr.bf16.mxu0 %v1092_v18  ;;  %936 = vmatprep.subr.bf16.mxu1 %v1092_v18 }
  0xe1   :  { %773 = vmatpush1.bf16.msra.mxu0 %v1090_v19  ;;  %952 = vmatpush1.bf16.msra.mxu1 %v1090_v19 }
  0xe2   :  { %774 = vmatprep.subr.bf16.mxu0 %v1095_v20  ;;  %937 = vmatprep.subr.bf16.mxu1 %v1095_v20 }
  0xe5   :  { %775 = vmatpush1.bf16.msra.mxu0 %v1093_v21  ;;  %953 = vmatpush1.bf16.msra.mxu1 %v1093_v21 }
  0xe6   :  { %776 = vmatprep.subr.bf16.mxu0 %v1098_v22  ;;  %938 = vmatprep.subr.bf16.mxu1 %v1098_v22 }
  0xe9   :  { %777 = vmatpush1.bf16.msra.mxu0 %v1096_v23  ;;  %954 = vmatpush1.bf16.msra.mxu1 %v1096_v23 }
  0xec   :  { %779 = vmatmul.mubr.bf16.vlgmr.msra.gmra.mrb[8].mxu0 %v1382_v53  ;;  %789 = vmatmul.mubr.bf16.vlgmr.msra.gmra.mrb[8].mxu1 %v1397_v54 }
 0x17f   :  { %v674_v24 = vpop.f32.mrb[0].mxu0  ;;  %v727_v25 = vpop.f32.mrb[0].mxu1 }
 0x180   :  { %799 = vst [vmem:[%s1558_s2] sm:$0xff] %v674_v24  ;;  %801 = vst [vmem:[%s1558_s2 + $0x10] sm:$0xff] %v727_v25  ;;  %v676_v26 = vpop.f32.mrb[1].mxu0  ;;  %v729_v27 = vpop.f32.mrb[1].mxu1 }
 0x181   :  { %800 = vst [vmem:[%s1558_s2 + $0x8] sm:$0xff] %v676_v26  ;;  %802 = vst [vmem:[%s1558_s2 + $0x18] sm:$0xff] %v729_v27  ;;  %v678_v28 = vpop.f32.mrb[2].mxu0  ;;  %v731_v29 = vpop.f32.mrb[2].mxu1 }
 0x182   :  { %805 = vst [vmem:[%s1558_s2 + $0x30] sm:$0xff] %v678_v28  ;;  %807 = vst [vmem:[%s1558_s2 + $0x40] sm:$0xff] %v731_v29  ;;  %v680_v30 = vpop.f32.mrb[3].mxu0  ;;  %v733_v31 = vpop.f32.mrb[3].mxu1 }
 0x183   :  { %806 = vst [vmem:[%s1558_s2 + $0x38] sm:$0xff] %v680_v30  ;;  %808 = vst [vmem:[%s1558_s2 + $0x48] sm:$0xff] %v733_v31 }
 0x187   :  { %v684_v32 = vpop.f32.mrb[4].mxu0  ;;  %v737_v33 = vpop.f32.mrb[4].mxu1 }
 0x188   :  { %811 = vst [vmem:[%s1558_s2 + $0x60] sm:$0xff] %v684_v32  ;;  %813 = vst [vmem:[%s1558_s2 + $0x70] sm:$0xff] %v737_v33  ;;  %v686_v34 = vpop.f32.mrb[5].mxu0  ;;  %v739_v35 = vpop.f32.mrb[5].mxu1 }
 0x189   :  { %812 = vst [vmem:[%s1558_s2 + $0x68] sm:$0xff] %v686_v34  ;;  %814 = vst [vmem:[%s1558_s2 + $0x78] sm:$0xff] %v739_v35  ;;  %v688_v36 = vpop.f32.mrb[6].mxu0  ;;  %v741_v37 = vpop.f32.mrb[6].mxu1 }
 0x18a   :  { %817 = vst [vmem:[%s1558_s2 + $0x90] sm:$0xff] %v688_v36  ;;  %819 = vst [vmem:[%s1558_s2 + $0xa0] sm:$0xff] %v741_v37  ;;  %v690_v38 = vpop.f32.mrb[7].mxu0  ;;  %v743_v39 = vpop.f32.mrb[7].mxu1 }
 0x18b   :  { %818 = vst [vmem:[%s1558_s2 + $0x98] sm:$0xff] %v690_v38  ;;  %820 = vst [vmem:[%s1558_s2 + $0xa8] sm:$0xff] %v743_v39 }
 0x1bf   :  { %v780_v40 = vpop.f32.mrb[8].mxu0  ;;  %v790_v41 = vpop.f32.mrb[8].mxu1 }
 0x1c0   :  { %803 = vst [vmem:[%s1558_s2 + $0x20] sm:$0xff] %v780_v40  ;;  %815 = vst [vmem:[%s1558_s2 + $0x80] sm:$0xff] %v790_v41  ;;  %v782_v42 = vpop.f32.mrb[9].mxu0  ;;  %v792_v43 = vpop.f32.mrb[9].mxu1 }
 0x1c1   :  { %804 = vst [vmem:[%s1558_s2 + $0x28] sm:$0xff] %v782_v42  ;;  %816 = vst [vmem:[%s1558_s2 + $0x88] sm:$0xff] %v792_v43  ;;  %v784_v44 = vpop.f32.mrb[10].mxu0  ;;  %v794_v45 = vpop.f32.mrb[10].mxu1 }
 0x1c2   :  { %809 = vst [vmem:[%s1558_s2 + $0x50] sm:$0xff] %v784_v44  ;;  %821 = vst [vmem:[%s1558_s2 + $0xb0] sm:$0xff] %v794_v45  ;;  %v786_v46 = vpop.f32.mrb[11].mxu0  ;;  %v796_v47 = vpop.f32.mrb[11].mxu1 }
 0x1c3   :  { %810 = vst [vmem:[%s1558_s2 + $0x58] sm:$0xff] %v786_v46  ;;  %822 = vst [vmem:[%s1558_s2 + $0xb8] sm:$0xff] %v796_v47 }

// kernel: block_forward.7
= control target key start
LH: loop header
LB: loop body
LE: loop exit
PB: predicated region body
PF: predicated region fallthrough
CT: control target
= control target key end

     0   :  { %s3058_s0 = inlined_call_operand.vmem [shape: f32[32,256], index: 0, kind: input, shape index: {}, may-alias: {0,4}]   ;;  %s3059_s1 = inlined_call_operand.vmem [shape: bf16[256,512], index: 1, kind: input, shape index: {}]   ;;  %s3060_s2 = inlined_call_operand.vmem [shape: bf16[256,512], index: 2, kind: input, shape index: {}]   ;;  %s3061_s3 = inlined_call_operand.vmem [shape: bf16[512,256], index: 3, kind: input, shape index: {}]   ;;  %s3062_s4 = inlined_call_operand.vmem [shape: f32[32,256], index: 4, kind: output, shape index: {}, may-alias: {0,4}]  }
   0x1   :  { %v2308_v0 = vld [vmem:[%s3058_s0] sm:$0xff]  ;;  %v2313_v1 = vld [vmem:[%s3058_s0 + $0x8] sm:$0xff]  ;;  %v2318_v2 = vld [vmem:[%s3058_s0 + $0x10] sm:$0xff] }
   0x2   :  { %v25_v3 = vmul.f32 %v2308_v0, %v2308_v0  ;;  %v26_v4 = vmul.f32 %v2313_v1, %v2313_v1  ;;  %v2327_v5 = vld [vmem:[%s3058_s0 + $0x18] sm:$0xff]  ;;  %v27_v6 = vmul.f32 %v2318_v2, %v2318_v2  ;;  %v2334_v7 = vld [vmem:[%s3058_s0 + $0x20] sm:$0xff]  ;;  %v2339_v8 = vld [vmem:[%s3058_s0 + $0x28] sm:$0xff] }
   0x3   :  { %v28_v9 = vmul.f32 %v2327_v5, %v2327_v5  ;;  %v29_v10 = vmul.f32 %v2334_v7, %v2334_v7  ;;  %v30_v11 = vmul.f32 %v2339_v8, %v2339_v8  ;;  %v2350_v12 = vld [vmem:[%s3058_s0 + $0x30] sm:$0xff]  ;;  %v2355_v13 = vld [vmem:[%s3058_s0 + $0x38] sm:$0xff] }
   0x4   :  { %v33_v14 = vadd.f32 %v26_v4, %v25_v3  ;;  %v31_v15 = vmul.f32 %v2350_v12, %v2350_v12  ;;  %v32_v16 = vmul.f32 %v2355_v13, %v2355_v13  ;;  %v1912_v17 = vld [vmem:[%s3059_s1 + $0x4] ss:$16 sps:$4 sm:$0xff]   ;;  %v1914_v18 = vld [vmem:[%s3059_s1] ss:$16 sps:$4 sm:$0xff]  }
   0x5   :  { %v39_v19 = vadd.f32 %v30_v11, %v29_v10  ;;  %v1915_v20 = vld [vmem:[%s3060_s2 + $0x4] ss:$16 sps:$4 sm:$0xff]   ;;  %v36_v21 = vadd.f32 %v28_v9, %v27_v6  ;;  %454 = vmatprep.subr.bf16.mxu1 %v1912_v17  ;;  %v1917_v22 = vld [vmem:[%s3060_s2] ss:$16 sps:$4 sm:$0xff]  }
   0x6   :  { %34 = vadd.xlane.f32.xlu0 %v33_v14  ;;  %v42_v23 = vadd.f32 %v32_v16, %v31_v15  ;;  %455 = vmatpush1.bf16.msra.mxu1 %v1914_v18  ;;  %v1918_v24 = vld [vmem:[%s3059_s1 + $0x24] ss:$16 sps:$4 sm:$0xff]   ;;  %v1920_v25 = vld [vmem:[%s3059_s1 + $0x20] ss:$16 sps:$4 sm:$0xff]  }
   0x7   :  { %40 = vadd.xlane.f32.xlu1 %v39_v19  ;;  %944 = vmatprep.subr.bf16.mxu0 %v1915_v20  ;;  %v1921_v26 = vld [vmem:[%s3060_s2 + $0x24] ss:$16 sps:$4 sm:$0xff]   ;;  %v1923_v27 = vld [vmem:[%s3060_s2 + $0x20] ss:$16 sps:$4 sm:$0xff]  }
   0x8   :  { %945 = vmatpush1.bf16.msra.mxu0 %v1917_v22  ;;  %456 = vmatprep.subr.bf16.mxu1 %v1918_v24  ;;  %v1924_v28 = vld [vmem:[%s3059_s1 + $0x44] ss:$16 sps:$4 sm:$0xff]   ;;  %v1926_v29 = vld [vmem:[%s3059_s1 + $0x40] ss:$16 sps:$4 sm:$0xff]  }
   0x9   :  { %946 = vmatprep.subr.bf16.mxu0 %v1921_v26  ;;  %v1927_v30 = vld [vmem:[%s3060_s2 + $0x44] ss:$16 sps:$4 sm:$0xff]   ;;  %v1929_v32 = vld [vmem:[%s3060_s2 + $0x40] ss:$16 sps:$4 sm:$0xff]  }
   0xa   :  { %37 = vadd.xlane.f32.xlu0 %v36_v21  ;;  %457 = vmatpush1.bf16.msra.mxu1 %v1920_v25  ;;  %v1930_v31 = vld [vmem:[%s3059_s1 + $0x64] ss:$16 sps:$4 sm:$0xff]   ;;  %v1932_v34 = vld [vmem:[%s3059_s1 + $0x60] ss:$16 sps:$4 sm:$0xff]  }
   0xb   :  { %43 = vadd.xlane.f32.xlu1 %v42_v23  ;;  %458 = vmatprep.subr.bf16.mxu1 %v1924_v28  ;;  %v1933_v33 = vld [vmem:[%s3060_s2 + $0x64] ss:$16 sps:$4 sm:$0xff]   ;;  %v1935_v36 = vld [vmem:[%s3060_s2 + $0x60] ss:$16 sps:$4 sm:$0xff]  }
   0xc   :  { %947 = vmatpush1.bf16.msra.mxu0 %v1923_v27  ;;  %v1936_v35 = vld [vmem:[%s3059_s1 + $0x84] ss:$16 sps:$4 sm:$0xff]   ;;  %v1938_v38 = vld [vmem:[%s3059_s1 + $0x80] ss:$16 sps:$4 sm:$0xff]   ;;  %v2010_v27 = vld [vmem:[%s3059_s1 + $0xc] ss:$16 sps:$4 sm:$0xff]  }
   0xd   :  { %948 = vmatprep.subr.bf16.mxu0 %v1927_v30  ;;  %v1939_v37 = vld [vmem:[%s3060_s2 + $0x84] ss:$16 sps:$4 sm:$0xff]   ;;  %v1941_v40 = vld [vmem:[%s3060_s2 + $0x80] ss:$16 sps:$4 sm:$0xff]  }
   0xe   :  { %459 = vmatpush1.bf16.msra.mxu1 %v1926_v29  ;;  %v1942_v39 = vld [vmem:[%s3059_s1 + $0xa4] ss:$16 sps:$4 sm:$0xff]   ;;  %v1944_v42 = vld [vmem:[%s3059_s1 + $0xa0] ss:$16 sps:$4 sm:$0xff]  }
   0xf   :  { %460 = vmatprep.subr.bf16.mxu1 %v1930_v31  ;;  %v1945_v41 = vld [vmem:[%s3060_s2 + $0xa4] ss:$16 sps:$4 sm:$0xff]   ;;  %v1947_v44 = vld [vmem:[%s3060_s2 + $0xa0] ss:$16 sps:$4 sm:$0xff]  }
  0x10   :  { %949 = vmatpush1.bf16.msra.mxu0 %v1929_v32  ;;  %v1948_v43 = vld [vmem:[%s3059_s1 + $0xc4] ss:$16 sps:$4 sm:$0xff]   ;;  %v1950_v46 = vld [vmem:[%s3059_s1 + $0xc0] ss:$16 sps:$4 sm:$0xff]  }
  0x11   :  { %950 = vmatprep.subr.bf16.mxu0 %v1933_v33  ;;  %v1951_v45 = vld [vmem:[%s3060_s2 + $0xc4] ss:$16 sps:$4 sm:$0xff]   ;;  %v1953_v48 = vld [vmem:[%s3060_s2 + $0xc0] ss:$16 sps:$4 sm:$0xff]  }
  0x12   :  { %461 = vmatpush1.bf16.msra.mxu1 %v1932_v34  ;;  %v1954_v47 = vld [vmem:[%s3059_s1 + $0xe4] ss:$16 sps:$4 sm:$0xff]   ;;  %v1956_v50 = vld [vmem:[%s3059_s1 + $0xe0] ss:$16 sps:$4 sm:$0xff]  }
  0x13   :  { %462 = vmatprep.subr.bf16.mxu1 %v1936_v35  ;;  %v1957_v49 = vld [vmem:[%s3060_s2 + $0xe4] ss:$16 sps:$4 sm:$0xff]   ;;  %v1959_v52 = vld [vmem:[%s3060_s2 + $0xe0] ss:$16 sps:$4 sm:$0xff]  }
  0x14   :  { %951 = vmatpush1.bf16.msra.mxu0 %v1935_v36  ;;  %v1960_v51 = vld [vmem:[%s3059_s1 + $0x104] ss:$16 sps:$4 sm:$0xff]   ;;  %v1962_v54 = vld [vmem:[%s3059_s1 + $0x100] ss:$16 sps:$4 sm:$0xff]  }
  0x15   :  { %952 = vmatprep.subr.bf16.mxu0 %v1939_v37  ;;  %v1963_v53 = vld [vmem:[%s3060_s2 + $0x104] ss:$16 sps:$4 sm:$0xff]   ;;  %v1965_v56 = vld [vmem:[%s3060_s2 + $0x100] ss:$16 sps:$4 sm:$0xff]  }
  0x16   :  { %463 = vmatpush1.bf16.msra.mxu1 %v1938_v38  ;;  %v1966_v55 = vld [vmem:[%s3059_s1 + $0x124] ss:$16 sps:$4 sm:$0xff]   ;;  %v1968_v58 = vld [vmem:[%s3059_s1 + $0x120] ss:$16 sps:$4 sm:$0xff]  }
  0x17   :  { %464 = vmatprep.subr.bf16.mxu1 %v1942_v39  ;;  %v1969_v57 = vld [vmem:[%s3060_s2 + $0x124] ss:$16 sps:$4 sm:$0xff]   ;;  %v1971_v60 = vld [vmem:[%s3060_s2 + $0x120] ss:$16 sps:$4 sm:$0xff]  }
  0x18   :  { %953 = vmatpush1.bf16.msra.mxu0 %v1941_v40  ;;  %v1972_v59 = vld [vmem:[%s3059_s1 + $0x144] ss:$16 sps:$4 sm:$0xff]   ;;  %v1974_v62 = vld [vmem:[%s3059_s1 + $0x140] ss:$16 sps:$4 sm:$0xff]  }
  0x19   :  { %954 = vmatprep.subr.bf16.mxu0 %v1945_v41  ;;  %v1975_v61 = vld [vmem:[%s3060_s2 + $0x144] ss:$16 sps:$4 sm:$0xff]   ;;  %v1977_v3 = vld [vmem:[%s3060_s2 + $0x140] ss:$16 sps:$4 sm:$0xff]  }
  0x1a   :  { %465 = vmatpush1.bf16.msra.mxu1 %v1944_v42  ;;  %v1978_v63 = vld [vmem:[%s3059_s1 + $0x164] ss:$16 sps:$4 sm:$0xff]   ;;  %v1980_v6 = vld [vmem:[%s3059_s1 + $0x160] ss:$16 sps:$4 sm:$0xff]  }
  0x1b   :  { %466 = vmatprep.subr.bf16.mxu1 %v1948_v43  ;;  %v1981_v4 = vld [vmem:[%s3060_s2 + $0x164] ss:$16 sps:$4 sm:$0xff]   ;;  %v1983_v9 = vld [vmem:[%s3060_s2 + $0x160] ss:$16 sps:$4 sm:$0xff]  }
  0x1c   :  { %955 = vmatpush1.bf16.msra.mxu0 %v1947_v44  ;;  %v1984_v10 = vld [vmem:[%s3059_s1 + $0x184] ss:$16 sps:$4 sm:$0xff]   ;;  %v1986_v11 = vld [vmem:[%s3059_s1 + $0x180] ss:$16 sps:$4 sm:$0xff]  }
  0x1d   :  { %956 = vmatprep.subr.bf16.mxu0 %v1951_v45  ;;  %v1987_v14 = vld [vmem:[%s3060_s2 + $0x184] ss:$16 sps:$4 sm:$0xff]   ;;  %v1989_v16 = vld [vmem:[%s3060_s2 + $0x180] ss:$16 sps:$4 sm:$0xff]  }
  0x1e   :  { %467 = vmatpush1.bf16.msra.mxu1 %v1950_v46  ;;  %v1990_v15 = vld [vmem:[%s3059_s1 + $0x1a4] ss:$16 sps:$4 sm:$0xff]   ;;  %v1992_v17 = vld [vmem:[%s3059_s1 + $0x1a0] ss:$16 sps:$4 sm:$0xff]  }
  0x1f   :  { %468 = vmatprep.subr.bf16.mxu1 %v1954_v47  ;;  %v1993_v18 = vld [vmem:[%s3060_s2 + $0x1a4] ss:$16 sps:$4 sm:$0xff]   ;;  %v1995_v20 = vld [vmem:[%s3060_s2 + $0x1a0] ss:$16 sps:$4 sm:$0xff]  }
  0x20   :  { %957 = vmatpush1.bf16.msra.mxu0 %v1953_v48  ;;  %v1996_v19 = vld [vmem:[%s3059_s1 + $0x1c4] ss:$16 sps:$4 sm:$0xff]   ;;  %v1998_v21 = vld [vmem:[%s3059_s1 + $0x1c0] ss:$16 sps:$4 sm:$0xff]  }
  0x21   :  { %958 = vmatprep.subr.bf16.mxu0 %v1957_v49  ;;  %v1999_v22 = vld [vmem:[%s3060_s2 + $0x1c4] ss:$16 sps:$4 sm:$0xff]   ;;  %v2001_v24 = vld [vmem:[%s3060_s2 + $0x1c0] ss:$16 sps:$4 sm:$0xff]  }
  0x22   :  { %469 = vmatpush1.bf16.msra.mxu1 %v1956_v50  ;;  %v2002_v23 = vld [vmem:[%s3059_s1 + $0x1e4] ss:$16 sps:$4 sm:$0xff]   ;;  %v2004_v25 = vld [vmem:[%s3059_s1 + $0x1e0] ss:$16 sps:$4 sm:$0xff]  }
  0x23   :  { %470 = vmatprep.subr.bf16.mxu1 %v1960_v51  ;;  %v2005_v26 = vld [vmem:[%s3060_s2 + $0x1e4] ss:$16 sps:$4 sm:$0xff]   ;;  %v2007_v28 = vld [vmem:[%s3060_s2 + $0x1e0] ss:$16 sps:$4 sm:$0xff]  }
  0x24   :  { %959 = vmatpush1.bf16.msra.mxu0 %v1959_v52  ;;  %v2008_v52 = vld [vmem:[%s3059_s1 + $0x8] ss:$16 sps:$4 sm:$0xff]  }
  0x25   :  { %960 = vmatprep.subr.bf16.mxu0 %v1963_v53 }
  0x26   :  { %471 = vmatpush1.bf16.msra.mxu1 %v1962_v54 }
  0x27   :  { %472 = vmatprep.subr.bf16.mxu1 %v1966_v55  ;;  %v2017_v55 = vld [vmem:[%s3059_s1 + $0x68] ss:$16 sps:$4 sm:$0xff]  }
  0x28   :  { %961 = vmatpush1.bf16.msra.mxu0 %v1965_v56  ;;  %v2022_v56 = vld [vmem:[%s3059_s1 + $0x8c] ss:$16 sps:$4 sm:$0xff]  }
  0x29   :  { %962 = vmatprep.subr.bf16.mxu0 %v1969_v57  ;;  %v2104_v57 = vld [vmem:[%s3061_s3] ss:$8 sps:$4 sm:$0xff]  }
  0x2a   :  { %473 = vmatpush1.bf16.msra.mxu1 %v1968_v58  ;;  %v2106_v58 = vld [vmem:[%s3061_s3 + $0x4] ss:$8 sps:$4 sm:$0xff]  }
  0x2b   :  { %474 = vmatprep.subr.bf16.mxu1 %v1972_v59  ;;  %v2109_v59 = vld [vmem:[%s3061_s3 + $0x14] ss:$8 sps:$4 sm:$0xff]  }
  0x2c   :  { %963 = vmatpush1.bf16.msra.mxu0 %v1971_v60  ;;  %v2020_v60 = vld [vmem:[%s3059_s1 + $0x88] ss:$16 sps:$4 sm:$0xff]  }
  0x2d   :  { %964 = vmatprep.subr.bf16.mxu0 %v1975_v61  ;;  %v2025_v61 = vld [vmem:[%s3059_s1 + $0xac] ss:$16 sps:$4 sm:$0xff]  }
  0x2e   :  { %475 = vmatpush1.bf16.msra.mxu1 %v1974_v62  ;;  %v2107_v62 = vld [vmem:[%s3061_s3 + $0x10] ss:$8 sps:$4 sm:$0xff]  }
  0x2f   :  { %476 = vmatprep.subr.bf16.mxu1 %v1978_v63  ;;  %v2112_v63 = vld [vmem:[%s3061_s3 + $0x24] ss:$8 sps:$4 sm:$0xff]  }
  0x30   :  { %965 = vmatpush1.bf16.msra.mxu0 %v1977_v3  ;;  %v2023_v3 = vld [vmem:[%s3059_s1 + $0xa8] ss:$16 sps:$4 sm:$0xff]  }
  0x31   :  { %966 = vmatprep.subr.bf16.mxu0 %v1981_v4  ;;  %v2028_v4 = vld [vmem:[%s3059_s1 + $0xcc] ss:$16 sps:$4 sm:$0xff]  }
  0x32   :  { %477 = vmatpush1.bf16.msra.mxu1 %v1980_v6  ;;  %v2110_v6 = vld [vmem:[%s3061_s3 + $0x20] ss:$8 sps:$4 sm:$0xff]  }
  0x33   :  { %478 = vmatprep.subr.bf16.mxu1 %v1984_v10  ;;  %v2026_v10 = vld [vmem:[%s3059_s1 + $0xc8] ss:$16 sps:$4 sm:$0xff]  }
  0x34   :  { %967 = vmatpush1.bf16.msra.mxu0 %v1983_v9  ;;  %v2115_v9 = vld [vmem:[%s3061_s3 + $0x34] ss:$8 sps:$4 sm:$0xff]  }
  0x35   :  { %968 = vmatprep.subr.bf16.mxu0 %v1987_v14  ;;  %v2031_v14 = vld [vmem:[%s3059_s1 + $0xec] ss:$16 sps:$4 sm:$0xff]  }
  0x36   :  { %479 = vmatpush1.bf16.msra.mxu1 %v1986_v11  ;;  %v2113_v11 = vld [vmem:[%s3061_s3 + $0x30] ss:$8 sps:$4 sm:$0xff]  }
  0x37   :  { %480 = vmatprep.subr.bf16.mxu1 %v1990_v15  ;;  %v2118_v15 = vld [vmem:[%s3061_s3 + $0x44] ss:$8 sps:$4 sm:$0xff]  }
  0x38   :  { %969 = vmatpush1.bf16.msra.mxu0 %v1989_v16  ;;  %v2029_v16 = vld [vmem:[%s3059_s1 + $0xe8] ss:$16 sps:$4 sm:$0xff]  }
  0x39   :  { %970 = vmatprep.subr.bf16.mxu0 %v1993_v18  ;;  %v2034_v18 = vld [vmem:[%s3059_s1 + $0x10c] ss:$16 sps:$4 sm:$0xff]  }
  0x3a   :  { %481 = vmatpush1.bf16.msra.mxu1 %v1992_v17  ;;  %v2116_v17 = vld [vmem:[%s3061_s3 + $0x40] ss:$8 sps:$4 sm:$0xff]  }
  0x3b   :  { %482 = vmatprep.subr.bf16.mxu1 %v1996_v19  ;;  %v2121_v19 = vld [vmem:[%s3061_s3 + $0x54] ss:$8 sps:$4 sm:$0xff]  }
  0x3c   :  { %971 = vmatpush1.bf16.msra.mxu0 %v1995_v20  ;;  %v2032_v20 = vld [vmem:[%s3059_s1 + $0x108] ss:$16 sps:$4 sm:$0xff]  }
  0x3d   :  { %972 = vmatprep.subr.bf16.mxu0 %v1999_v22  ;;  %v2037_v22 = vld [vmem:[%s3059_s1 + $0x12c] ss:$16 sps:$4 sm:$0xff]  }
  0x3e   :  { %483 = vmatpush1.bf16.msra.mxu1 %v1998_v21  ;;  %v2119_v21 = vld [vmem:[%s3061_s3 + $0x50] ss:$8 sps:$4 sm:$0xff]  }
  0x3f   :  { %484 = vmatprep.subr.bf16.mxu1 %v2002_v23  ;;  %v2124_v23 = vld [vmem:[%s3061_s3 + $0x64] ss:$8 sps:$4 sm:$0xff]  }
  0x40   :  { %973 = vmatpush1.bf16.msra.mxu0 %v2001_v24  ;;  %v2035_v24 = vld [vmem:[%s3059_s1 + $0x128] ss:$16 sps:$4 sm:$0xff]  }
  0x41   :  { %974 = vmatprep.subr.bf16.mxu0 %v2005_v26  ;;  %v2040_v26 = vld [vmem:[%s3059_s1 + $0x14c] ss:$16 sps:$4 sm:$0xff]  }
  0x42   :  { %485 = vmatpush1.bf16.msra.mxu1 %v2004_v25  ;;  %v2122_v25 = vld [vmem:[%s3061_s3 + $0x60] ss:$8 sps:$4 sm:$0xff]  }
  0x43   :  { %507 = vmatprep.subr.bf16.mxu1 %v2010_v27  ;;  %v2038_v27 = vld [vmem:[%s3059_s1 + $0x148] ss:$16 sps:$4 sm:$0xff]  }
  0x44   :  { %975 = vmatpush1.bf16.msra.mxu0 %v2007_v28  ;;  %v2043_v28 = vld [vmem:[%s3059_s1 + $0x16c] ss:$16 sps:$4 sm:$0xff]  }
  0x45   :  { %1570 = vmatprep.subr.bf16.mxu0 %v2106_v58  ;;  %v2136_v58 = vld [vmem:[%s3061_s3 + $0xa4] ss:$8 sps:$4 sm:$0xff]  }
  0x93   :  { %v35_v29 = vpop.xlane.xlu0 %34 }
  0x94   :  { %v46_v30 = vmul.f32 0.00390625, %v35_v29  ;;  %v41_v31 = vpop.xlane.xlu1 %40  ;;  %v2041_v29 = vld [vmem:[%s3059_s1 + $0x168] ss:$16 sps:$4 sm:$0xff]  }
  0x95   :  { %v48_v32 = vmul.f32 0.00390625, %v41_v31  ;;  %v2044_v31 = vld [vmem:[%s3059_s1 + $0x188] ss:$16 sps:$4 sm:$0xff]  }
  0x96   :  { %v50_v33 = vadd.f32 1e-06, %v46_v30  ;;  %v2046_v30 = vld [vmem:[%s3059_s1 + $0x18c] ss:$16 sps:$4 sm:$0xff]  }
  0x97   :  { %v38_v34 = vpop.xlane.xlu0 %37  ;;  %v52_v35 = vadd.f32 1e-06, %v48_v32  ;;  %v2049_v32 = vld [vmem:[%s3059_s1 + $0x1ac] ss:$16 sps:$4 sm:$0xff]  }
  0x98   :  { %v47_v36 = vmul.f32 0.00390625, %v38_v34  ;;  %v44_v37 = vpop.xlane.xlu1 %43  ;;  %v2052_v34 = vld [vmem:[%s3059_s1 + $0x1cc] ss:$16 sps:$4 sm:$0xff]  }
  0x99   :  { %2200 = vrsqrt.f32 %v52_v35  ;;  %v49_v38 = vmul.f32 0.00390625, %v44_v37  ;;  %v2050_v35 = vld [vmem:[%s3059_s1 + $0x1c8] ss:$16 sps:$4 sm:$0xff]  }
  0x9a   :  { %2202 = vrsqrt.f32 %v50_v33  ;;  %v51_v39 = vadd.f32 1e-06, %v47_v36  ;;  %v2047_v33 = vld [vmem:[%s3059_s1 + $0x1a8] ss:$16 sps:$4 sm:$0xff]   ;;  %v2055_v36 = vld [vmem:[%s3059_s1 + $0x1ec] ss:$16 sps:$4 sm:$0xff]  }
  0x9b   :  { %v53_v40 = vadd.f32 1e-06, %v49_v38  ;;  %v2053_v37 = vld [vmem:[%s3059_s1 + $0x1e8] ss:$16 sps:$4 sm:$0xff]   ;;  %v2058_v38 = vld [vmem:[%s3060_s2 + $0xc] ss:$16 sps:$4 sm:$0xff]  }
  0x9c   :  { %2204 = vrsqrt.f32 %v51_v39  ;;  %v2056_v39 = vld [vmem:[%s3060_s2 + $0x8] ss:$16 sps:$4 sm:$0xff]  }
  0x9d   :  { %2206 = vrsqrt.f32 %v53_v40  ;;  %v2061_v40 = vld [vmem:[%s3060_s2 + $0x2c] ss:$16 sps:$4 sm:$0xff]  }
  0xa3   :  { %v2201_v41 = vpop.eup %2200 }
  0xa4   :  { %v2203_v42 = vpop.eup %2202  ;;  %v63_v44 = vmul.f32 %v2201_v41, %v2339_v8 }
  0xa5   :  { %v59_v46 = vmul.f32 %v2203_v42, %v2313_v1  ;;  %v58_v48 = vmul.f32 %v2203_v42, %v2308_v0  ;;  %v2013_v1 = vld [vmem:[%s3059_s1 + $0x2c] ss:$16 sps:$4 sm:$0xff]   ;;  %v62_v0 = vmul.f32 %v2201_v41, %v2334_v7  ;;  %v2014_v7 = vld [vmem:[%s3059_s1 + $0x48] ss:$16 sps:$4 sm:$0xff]  }
  0xa6   :  { %v2205_v43 = vpop.eup %2204  ;;  %v2059_v41 = vld [vmem:[%s3060_s2 + $0x28] ss:$16 sps:$4 sm:$0xff]   ;;  %v2064_v42 = vld [vmem:[%s3060_s2 + $0x4c] ss:$16 sps:$4 sm:$0xff]  }
  0xa7   :  { %v2207_v45 = vpop.eup %2206  ;;  %v61_v47 = vmul.f32 %v2205_v43, %v2327_v5  ;;  %v60_v49 = vmul.f32 %v2205_v43, %v2318_v2  ;;  %v2011_v5 = vld [vmem:[%s3059_s1 + $0x28] ss:$16 sps:$4 sm:$0xff]  }
  0xa8   :  { %v65_v50 = vmul.f32 %v2207_v45, %v2355_v13  ;;  %v64_v2 = vmul.f32 %v2207_v45, %v2350_v12  ;;  %v2016_v13 = vld [vmem:[%s3059_s1 + $0x4c] ss:$16 sps:$4 sm:$0xff]   ;;  %v2062_v43 = vld [vmem:[%s3060_s2 + $0x48] ss:$16 sps:$4 sm:$0xff]  }
  0xa9   :  { %v2562_v51 = vpack.c.bf16 %v61_v47, %v59_v46  ;;  %v2567_v53 = vpack.c.bf16 %v60_v49, %v58_v48  ;;  %v2019_v12 = vld [vmem:[%s3059_s1 + $0x6c] ss:$16 sps:$4 sm:$0xff]   ;;  %v2065_v45 = vld [vmem:[%s3060_s2 + $0x68] ss:$16 sps:$4 sm:$0xff]  }
  0xaa   :  { %v2572_v8 = vpack.c.bf16 %v65_v50, %v63_v44  ;;  %v2588_v54 = vpack.c.bf16 %v64_v2, %v62_v0  ;;  %v2067_v44 = vld [vmem:[%s3060_s2 + $0x6c] ss:$16 sps:$4 sm:$0xff]   ;;  %v2068_v47 = vld [vmem:[%s3060_s2 + $0x88] ss:$16 sps:$4 sm:$0xff]  }
  0xab   :  { %486 = vmatprep.mubr.bf16.mxu1 %v2562_v51  ;;  %976 = vmatprep.mubr.bf16.mxu0 %v2562_v51  ;;  %v2070_v46 = vld [vmem:[%s3060_s2 + $0x8c] ss:$16 sps:$4 sm:$0xff]   ;;  %v2071_v49 = vld [vmem:[%s3060_s2 + $0xa8] ss:$16 sps:$4 sm:$0xff]  }
  0xac   :  { %487 = vmatmul.mubr.bf16.vlgmr.msra.gmra.mrb[0].mxu1 %v2567_v53  ;;  %977 = vmatmul.mubr.bf16.vlgmr.msra.gmra.mrb[0].mxu0 %v2567_v53  ;;  %v2073_v48 = vld [vmem:[%s3060_s2 + $0xac] ss:$16 sps:$4 sm:$0xff]  }
  0xad   :  { %508 = vmatpush1.bf16.msra.mxu1 %v2008_v52  ;;  %496 = vmatprep.mubr.bf16.mxu1 %v2572_v8  ;;  %v2076_v50 = vld [vmem:[%s3060_s2 + $0xcc] ss:$16 sps:$4 sm:$0xff]   ;;  %v2125_v52 = vld [vmem:[%s3061_s3 + $0x70] ss:$8 sps:$4 sm:$0xff]  }
  0xae   :  { %509 = vmatprep.subr.bf16.mxu1 %v2013_v1  ;;  %986 = vmatprep.mubr.bf16.mxu0 %v2572_v8  ;;  %v2074_v1 = vld [vmem:[%s3060_s2 + $0xc8] ss:$16 sps:$4 sm:$0xff]   ;;  %v2079_v0 = vld [vmem:[%s3060_s2 + $0xec] ss:$16 sps:$4 sm:$0xff]  }
  0xaf   :  { %1571 = vmatpush1.bf16.msra.mxu0 %v2104_v57  ;;  %v2130_v2 = vld [vmem:[%s3061_s3 + $0x84] ss:$8 sps:$4 sm:$0xff]  }
  0xb0   :  { %1572 = vmatprep.subr.bf16.mxu0 %v2109_v59  ;;  %v2085_v57 = vld [vmem:[%s3060_s2 + $0x12c] ss:$16 sps:$4 sm:$0xff]   ;;  %v2134_v59 = vld [vmem:[%s3061_s3 + $0xa0] ss:$8 sps:$4 sm:$0xff]  }
  0xb1   :  { %510 = vmatpush1.bf16.msra.mxu1 %v2011_v5  ;;  %v2128_v5 = vld [vmem:[%s3061_s3 + $0x80] ss:$8 sps:$4 sm:$0xff]  }
  0xb2   :  { %511 = vmatprep.subr.bf16.mxu1 %v2016_v13  ;;  %v2077_v13 = vld [vmem:[%s3060_s2 + $0xe8] ss:$16 sps:$4 sm:$0xff]  }
  0xb3   :  { %1573 = vmatpush1.bf16.msra.mxu0 %v2107_v62  ;;  %v2139_v62 = vld [vmem:[%s3061_s3 + $0xb4] ss:$8 sps:$4 sm:$0xff]  }
  0xb4   :  { %497 = vmatmul.mubr.bf16.gmra.mrb[4].mxu1 %v2588_v54  ;;  %987 = vmatmul.mubr.bf16.gmra.mrb[4].mxu0 %v2588_v54 }
  0xb5   :  { %512 = vmatpush1.bf16.msra.mxu1 %v2014_v7  ;;  %539 = vmatprep.mubr.bf16.mxu1 %v2562_v51  ;;  %v2082_v7 = vld [vmem:[%s3060_s2 + $0x10c] ss:$16 sps:$4 sm:$0xff]  }
  0xb6   :  { %513 = vmatprep.subr.bf16.mxu1 %v2019_v12  ;;  %1574 = vmatprep.subr.bf16.mxu0 %v2112_v63  ;;  %v2133_v12 = vld [vmem:[%s3061_s3 + $0x94] ss:$8 sps:$4 sm:$0xff]   ;;  %v2137_v63 = vld [vmem:[%s3061_s3 + $0xb0] ss:$8 sps:$4 sm:$0xff]  }
  0xb7   :  { %1575 = vmatpush1.bf16.msra.mxu0 %v2110_v6  ;;  %v2142_v6 = vld [vmem:[%s3061_s3 + $0xc4] ss:$8 sps:$4 sm:$0xff]  }
  0xb8   :  { %1576 = vmatprep.subr.bf16.mxu0 %v2115_v9  ;;  %v2140_v9 = vld [vmem:[%s3061_s3 + $0xc0] ss:$8 sps:$4 sm:$0xff]  }
  0xb9   :  { %514 = vmatpush1.bf16.msra.mxu1 %v2017_v55  ;;  %v2131_v55 = vld [vmem:[%s3061_s3 + $0x90] ss:$8 sps:$4 sm:$0xff]  }
  0xba   :  { %515 = vmatprep.subr.bf16.mxu1 %v2022_v56  ;;  %v2080_v56 = vld [vmem:[%s3060_s2 + $0x108] ss:$16 sps:$4 sm:$0xff]  }
  0xbb   :  { %1577 = vmatpush1.bf16.msra.mxu0 %v2113_v11  ;;  %v2094_v11 = vld [vmem:[%s3060_s2 + $0x18c] ss:$16 sps:$4 sm:$0xff]  }
  0xbc   :  { %1578 = vmatprep.subr.bf16.mxu0 %v2118_v15  ;;  %v2143_v15 = vld [vmem:[%s3061_s3 + $0xd0] ss:$8 sps:$4 sm:$0xff]  }
  0xbd   :  { %516 = vmatpush1.bf16.msra.mxu1 %v2020_v60  ;;  %v2083_v60 = vld [vmem:[%s3060_s2 + $0x128] ss:$16 sps:$4 sm:$0xff]  }
  0xbe   :  { %517 = vmatprep.subr.bf16.mxu1 %v2025_v61  ;;  %v2088_v61 = vld [vmem:[%s3060_s2 + $0x14c] ss:$16 sps:$4 sm:$0xff]  }
  0xbf   :  { %1579 = vmatpush1.bf16.msra.mxu0 %v2116_v17  ;;  %v2097_v17 = vld [vmem:[%s3060_s2 + $0x1ac] ss:$16 sps:$4 sm:$0xff]  }
  0xc0   :  { %1580 = vmatprep.subr.bf16.mxu0 %v2121_v19  ;;  %v2146_v19 = vld [vmem:[%s3061_s3 + $0xe0] ss:$8 sps:$4 sm:$0xff]  }
  0xc1   :  { %518 = vmatpush1.bf16.msra.mxu1 %v2023_v3  ;;  %v2086_v3 = vld [vmem:[%s3060_s2 + $0x148] ss:$16 sps:$4 sm:$0xff]  }
  0xc2   :  { %519 = vmatprep.subr.bf16.mxu1 %v2028_v4  ;;  %v2091_v4 = vld [vmem:[%s3060_s2 + $0x16c] ss:$16 sps:$4 sm:$0xff]  }
  0xc3   :  { %1581 = vmatpush1.bf16.msra.mxu0 %v2119_v21  ;;  %v2100_v21 = vld [vmem:[%s3060_s2 + $0x1cc] ss:$16 sps:$4 sm:$0xff]  }
  0xc4   :  { %1582 = vmatprep.subr.bf16.mxu0 %v2124_v23  ;;  %v2149_v23 = vld [vmem:[%s3061_s3 + $0xf0] ss:$8 sps:$4 sm:$0xff]  }
  0xc5   :  { %520 = vmatpush1.bf16.msra.mxu1 %v2026_v10  ;;  %v2089_v10 = vld [vmem:[%s3060_s2 + $0x168] ss:$16 sps:$4 sm:$0xff]  }
  0xc6   :  { %521 = vmatprep.subr.bf16.mxu1 %v2031_v14  ;;  %v2145_v14 = vld [vmem:[%s3061_s3 + $0xd4] ss:$8 sps:$4 sm:$0xff]  }
  0xc7   :  { %1583 = vmatpush1.bf16.msra.mxu0 %v2122_v25  ;;  %v2103_v25 = vld [vmem:[%s3060_s2 + $0x1ec] ss:$16 sps:$4 sm:$0xff]  }
  0xc9   :  { %522 = vmatpush1.bf16.msra.mxu1 %v2029_v16  ;;  %v2092_v16 = vld [vmem:[%s3060_s2 + $0x188] ss:$16 sps:$4 sm:$0xff]  }
  0xca   :  { %523 = vmatprep.subr.bf16.mxu1 %v2034_v18  ;;  %v2148_v18 = vld [vmem:[%s3061_s3 + $0xe4] ss:$8 sps:$4 sm:$0xff]  }
  0xcd   :  { %524 = vmatpush1.bf16.msra.mxu1 %v2032_v20  ;;  %v2095_v20 = vld [vmem:[%s3060_s2 + $0x1a8] ss:$16 sps:$4 sm:$0xff]  }
  0xce   :  { %525 = vmatprep.subr.bf16.mxu1 %v2037_v22  ;;  %v2151_v22 = vld [vmem:[%s3061_s3 + $0xf4] ss:$8 sps:$4 sm:$0xff]  }
  0xd1   :  { %526 = vmatpush1.bf16.msra.mxu1 %v2035_v24  ;;  %v2098_v24 = vld [vmem:[%s3060_s2 + $0x1c8] ss:$16 sps:$4 sm:$0xff]  }
  0xd2   :  { %527 = vmatprep.subr.bf16.mxu1 %v2040_v26  ;;  %v2101_v26 = vld [vmem:[%s3060_s2 + $0x1e8] ss:$16 sps:$4 sm:$0xff]  }
  0xd5   :  { %528 = vmatpush1.bf16.msra.mxu1 %v2038_v27  ;;  %v2154_v27 = vld [vmem:[%s3061_s3 + $0x104] ss:$8 sps:$4 sm:$0xff]  }
  0xd6   :  { %529 = vmatprep.subr.bf16.mxu1 %v2043_v28 }
  0xd9   :  { %530 = vmatpush1.bf16.msra.mxu1 %v2041_v29 }
  0xda   :  { %531 = vmatprep.subr.bf16.mxu1 %v2046_v30 }
  0xdd   :  { %532 = vmatpush1.bf16.msra.mxu1 %v2044_v31 }
  0xde   :  { %533 = vmatprep.subr.bf16.mxu1 %v2049_v32 }
  0xe1   :  { %534 = vmatpush1.bf16.msra.mxu1 %v2047_v33 }
  0xe2   :  { %535 = vmatprep.subr.bf16.mxu1 %v2052_v34 }
  0xe5   :  { %536 = vmatpush1.bf16.msra.mxu1 %v2050_v35 }
  0xe6   :  { %537 = vmatprep.subr.bf16.mxu1 %v2055_v36 }
  0xe9   :  { %538 = vmatpush1.bf16.msra.mxu1 %v2053_v37 }
  0xea   :  { %997 = vmatprep.subr.bf16.mxu1 %v2058_v38 }
  0xec   :  { %540 = vmatmul.mubr.bf16.vlgmr.msra.gmra.mrb[8].mxu1 %v2567_v53 }
  0xed   :  { %549 = vmatprep.mubr.bf16.mxu1 %v2572_v8  ;;  %998 = vmatpush1.bf16.msra.mxu1 %v2056_v39 }
  0xee   :  { %999 = vmatprep.subr.bf16.mxu1 %v2061_v40 }
  0xf1   :  { %1000 = vmatpush1.bf16.msra.mxu1 %v2059_v41 }
  0xf2   :  { %1001 = vmatprep.subr.bf16.mxu1 %v2064_v42 }
  0xf4   :  { %550 = vmatmul.mubr.bf16.gmra.mrb[12].mxu1 %v2588_v54 }
  0xf5   :  { %1002 = vmatpush1.bf16.msra.mxu1 %v2062_v43  ;;  %1029 = vmatprep.mubr.bf16.mxu1 %v2562_v51  ;;  %v2127_v51 = vld [vmem:[%s3061_s3 + $0x74] ss:$8 sps:$4 sm:$0xff]  }
  0xf6   :  { %1003 = vmatprep.subr.bf16.mxu1 %v2067_v44  ;;  %1584 = vmatprep.subr.bf16.mxu0 %v2127_v51 }
  0xf7   :  { %1585 = vmatpush1.bf16.msra.mxu0 %v2125_v52 }
  0xf8   :  { %1586 = vmatprep.subr.bf16.mxu0 %v2130_v2 }
  0xf9   :  { %1004 = vmatpush1.bf16.msra.mxu1 %v2065_v45 }
  0xfa   :  { %1005 = vmatprep.subr.bf16.mxu1 %v2070_v46 }
  0xfb   :  { %1587 = vmatpush1.bf16.msra.mxu0 %v2128_v5 }
  0xfc   :  { %1588 = vmatprep.subr.bf16.mxu0 %v2133_v12 }
  0xfd   :  { %1006 = vmatpush1.bf16.msra.mxu1 %v2068_v47 }
  0xfe   :  { %1007 = vmatprep.subr.bf16.mxu1 %v2073_v48 }
  0xff   :  { %1589 = vmatpush1.bf16.msra.mxu0 %v2131_v55 }
 0x100   :  { %1590 = vmatprep.subr.bf16.mxu0 %v2136_v58 }
 0x101   :  { %1008 = vmatpush1.bf16.msra.mxu1 %v2071_v49 }
 0x102   :  { %1009 = vmatprep.subr.bf16.mxu1 %v2076_v50 }
 0x103   :  { %1591 = vmatpush1.bf16.msra.mxu0 %v2134_v59 }
 0x104   :  { %1592 = vmatprep.subr.bf16.mxu0 %v2139_v62 }
 0x105   :  { %1010 = vmatpush1.bf16.msra.mxu1 %v2074_v1 }
 0x106   :  { %1011 = vmatprep.subr.bf16.mxu1 %v2079_v0 }
 0x107   :  { %1593 = vmatpush1.bf16.msra.mxu0 %v2137_v63 }
 0x108   :  { %1594 = vmatprep.subr.bf16.mxu0 %v2142_v6 }
 0x109   :  { %1012 = vmatpush1.bf16.msra.mxu1 %v2077_v13 }
 0x10a   :  { %1013 = vmatprep.subr.bf16.mxu1 %v2082_v7 }
 0x10b   :  { %1595 = vmatpush1.bf16.msra.mxu0 %v2140_v9 }
 0x10c   :  { %1596 = vmatprep.subr.bf16.mxu0 %v2145_v14 }
 0x10d   :  { %1014 = vmatpush1.bf16.msra.mxu1 %v2080_v56 }
 0x10e   :  { %1015 = vmatprep.subr.bf16.mxu1 %v2085_v57 }
 0x10f   :  { %1597 = vmatpush1.bf16.msra.mxu0 %v2143_v15 }
 0x110   :  { %1598 = vmatprep.subr.bf16.mxu0 %v2148_v18 }
 0x111   :  { %1016 = vmatpush1.bf16.msra.mxu1 %v2083_v60 }
 0x112   :  { %1017 = vmatprep.subr.bf16.mxu1 %v2088_v61 }
 0x113   :  { %1599 = vmatpush1.bf16.msra.mxu0 %v2146_v19  ;;  %v2152_v19 = vld [vmem:[%s3061_s3 + $0x100] ss:$8 sps:$4 sm:$0xff]  }
 0x114   :  { %1600 = vmatprep.subr.bf16.mxu0 %v2151_v22  ;;  %v2157_v22 = vld [vmem:[%s3061_s3 + $0x114] ss:$8 sps:$4 sm:$0xff]  }
 0x115   :  { %1018 = vmatpush1.bf16.msra.mxu1 %v2086_v3 }
 0x116   :  { %1019 = vmatprep.subr.bf16.mxu1 %v2091_v4 }
 0x117   :  { %1601 = vmatpush1.bf16.msra.mxu0 %v2149_v23 }
 0x118   :  { %1623 = vmatprep.subr.bf16.mxu0 %v2154_v27 }
 0x119   :  { %1020 = vmatpush1.bf16.msra.mxu1 %v2089_v10 }
 0x11a   :  { %1021 = vmatprep.subr.bf16.mxu1 %v2094_v11 }
 0x11d   :  { %1022 = vmatpush1.bf16.msra.mxu1 %v2092_v16 }
 0x11e   :  { %1023 = vmatprep.subr.bf16.mxu1 %v2097_v17 }
 0x121   :  { %1024 = vmatpush1.bf16.msra.mxu1 %v2095_v20 }
 0x122   :  { %1025 = vmatprep.subr.bf16.mxu1 %v2100_v21 }
 0x125   :  { %1026 = vmatpush1.bf16.msra.mxu1 %v2098_v24 }
 0x126   :  { %1027 = vmatprep.subr.bf16.mxu1 %v2103_v25 }
 0x129   :  { %1028 = vmatpush1.bf16.msra.mxu1 %v2101_v26 }
 0x12c   :  { %1030 = vmatmul.mubr.bf16.vlgmr.msra.gmra.mrb[16].mxu1 %v2567_v53 }
 0x12d   :  { %1039 = vmatprep.mubr.bf16.mxu1 %v2572_v8 }
 0x134   :  { %1040 = vmatmul.mubr.bf16.gmra.mrb[20].mxu1 %v2588_v54 }
 0x17f   :  { %v488_v28 = vpop.f32.mrb[0].mxu1  ;;  %v978_v29 = vpop.f32.mrb[0].mxu0 }
 0x180   :  { %v1824_v30 = vmul.f32 -1.442695, %v488_v28  ;;  %v490_v31 = vpop.f32.mrb[1].mxu1  ;;  %v980_v32 = vpop.f32.mrb[1].mxu0 }
 0x181   :  { %v1825_v33 = vmul.f32 -1.442695, %v490_v31  ;;  %v492_v34 = vpop.f32.mrb[2].mxu1  ;;  %v982_v35 = vpop.f32.mrb[2].mxu0 }
 0x182   :  { %2208 = vpow2.f32 %v1824_v30  ;;  %v1828_v36 = vmul.f32 -1.442695, %v492_v34  ;;  %v494_v53 = vpop.f32.mrb[3].mxu1  ;;  %v984_v37 = vpop.f32.mrb[3].mxu0  ;;  %v2155_v30 = vld [vmem:[%s3061_s3 + $0x110] ss:$8 sps:$4 sm:$0xff]  }
 0x183   :  { %2210 = vpow2.f32 %v1825_v33  ;;  %v1829_v8 = vmul.f32 -1.442695, %v494_v53 }
 0x184   :  { %2212 = vpow2.f32 %v1828_v36  ;;  %v2158_v36 = vld [vmem:[%s3061_s3 + $0x120] ss:$8 sps:$4 sm:$0xff]  }
 0x185   :  { %2214 = vpow2.f32 %v1829_v8  ;;  %v2166_v8 = vld [vmem:[%s3061_s3 + $0x144] ss:$8 sps:$4 sm:$0xff]  }
 0x187   :  { %v498_v54 = vpop.f32.mrb[4].mxu1  ;;  %v2876_v38 = vpop.f32.mrb[4].mxu0 }
 0x188   :  { %v1832_v39 = vmul.f32 -1.442695, %v498_v54  ;;  %v500_v40 = vpop.f32.mrb[5].mxu1  ;;  %v2878_v41 = vpop.f32.mrb[5].mxu0 }
 0x189   :  { %v1833_v42 = vmul.f32 -1.442695, %v500_v40  ;;  %v502_v43 = vpop.f32.mrb[6].mxu1  ;;  %v2880_v44 = vpop.f32.mrb[6].mxu0 }
 0x18a   :  { %2216 = vpow2.f32 %v1832_v39  ;;  %v1836_v45 = vmul.f32 -1.442695, %v502_v43  ;;  %v504_v46 = vpop.f32.mrb[7].mxu1  ;;  %v994_v47 = vpop.f32.mrb[7].mxu0  ;;  %v2167_v39 = vld [vmem:[%s3061_s3 + $0x150] ss:$8 sps:$4 sm:$0xff]  }
 0x18b   :  { %2218 = vpow2.f32 %v1833_v42  ;;  %v1837_v48 = vmul.f32 -1.442695, %v504_v46  ;;  %v2175_v42 = vld [vmem:[%s3061_s3 + $0x174] ss:$8 sps:$4 sm:$0xff]  }
 0x18c   :  { %v2209_v49 = vpop.eup %2208  ;;  %2220 = vpow2.f32 %v1836_v45 }
 0x18d   :  { %v2211_v50 = vpop.eup %2210  ;;  %v1098_v51 = vadd.f32 1.0, %v2209_v49  ;;  %2222 = vpow2.f32 %v1837_v48  ;;  %v2176_v48 = vld [vmem:[%s3061_s3 + $0x180] ss:$8 sps:$4 sm:$0xff]  }
 0x18e   :  { %v2213_v52 = vpop.eup %2212  ;;  %v1099_v1 = vadd.f32 1.0, %v2211_v50  ;;  %v2181_v50 = vld [vmem:[%s3061_s3 + $0x194] ss:$8 sps:$4 sm:$0xff]  }
 0x18f   :  { %v2215_v0 = vpop.eup %2214  ;;  %2224 = vrcp.f32 %v1098_v51  ;;  %v1102_v2 = vadd.f32 1.0, %v2213_v52  ;;  %v2179_v51 = vld [vmem:[%s3061_s3 + $0x190] ss:$8 sps:$4 sm:$0xff]   ;;  %v2184_v52 = vld [vmem:[%s3061_s3 + $0x1a4] ss:$8 sps:$4 sm:$0xff]  }
 0x190   :  { %2226 = vrcp.f32 %v1099_v1  ;;  %v1103_v5 = vadd.f32 1.0, %v2215_v0 }
 0x191   :  { %2228 = vrcp.f32 %v1102_v2 }
 0x192   :  { %2230 = vrcp.f32 %v1103_v5  ;;  %v2182_v5 = vld [vmem:[%s3061_s3 + $0x1a0] ss:$8 sps:$4 sm:$0xff]  }
 0x194   :  { %v2217_v13 = vpop.eup %2216 }
 0x195   :  { %v2219_v7 = vpop.eup %2218  ;;  %v1106_v12 = vadd.f32 1.0, %v2217_v13 }
 0x196   :  { %v2221_v55 = vpop.eup %2220  ;;  %v1107_v56 = vadd.f32 1.0, %v2219_v7  ;;  %v2187_v7 = vld [vmem:[%s3061_s3 + $0x1b4] ss:$8 sps:$4 sm:$0xff]  }
 0x197   :  { %v2223_v57 = vpop.eup %2222  ;;  %2232 = vrcp.f32 %v1106_v12  ;;  %v1110_v58 = vadd.f32 1.0, %v2221_v55  ;;  %v2185_v12 = vld [vmem:[%s3061_s3 + $0x1b0] ss:$8 sps:$4 sm:$0xff]   ;;  %v2190_v55 = vld [vmem:[%s3061_s3 + $0x1c4] ss:$8 sps:$4 sm:$0xff]  }
 0x198   :  { %2234 = vrcp.f32 %v1107_v56  ;;  %v1111_v59 = vadd.f32 1.0, %v2223_v57  ;;  %v2188_v56 = vld [vmem:[%s3061_s3 + $0x1c0] ss:$8 sps:$4 sm:$0xff]   ;;  %v2193_v57 = vld [vmem:[%s3061_s3 + $0x1d4] ss:$8 sps:$4 sm:$0xff]  }
 0x199   :  { %v2225_v60 = vpop.eup %2224  ;;  %2236 = vrcp.f32 %v1110_v58  ;;  %v2191_v58 = vld [vmem:[%s3061_s3 + $0x1d0] ss:$8 sps:$4 sm:$0xff]  }
 0x19a   :  { %v2227_v61 = vpop.eup %2226  ;;  %v1146_v62 = vmul.f32 %v2225_v60, %v488_v28  ;;  %2238 = vrcp.f32 %v1111_v59  ;;  %v2196_v59 = vld [vmem:[%s3061_s3 + $0x1e4] ss:$8 sps:$4 sm:$0xff]   ;;  %v2194_v60 = vld [vmem:[%s3061_s3 + $0x1e0] ss:$8 sps:$4 sm:$0xff]  }
 0x19b   :  { %v2229_v63 = vpop.eup %2228  ;;  %v1147_v3 = vmul.f32 %v2227_v61, %v490_v31  ;;  %v2199_v61 = vld [vmem:[%s3061_s3 + $0x1f4] ss:$8 sps:$4 sm:$0xff]  }
 0x19c   :  { %v2231_v4 = vpop.eup %2230  ;;  %v1162_v6 = vmul.f32 %v1146_v62, %v978_v29  ;;  %v1150_v9 = vmul.f32 %v2229_v63, %v492_v34 }
 0x19d   :  { %v1163_v10 = vmul.f32 %v1147_v3, %v980_v32  ;;  %v1151_v11 = vmul.f32 %v2231_v4, %v494_v53  ;;  %v2160_v32 = vld [vmem:[%s3061_s3 + $0x124] ss:$8 sps:$4 sm:$0xff]   ;;  %v2163_v53 = vld [vmem:[%s3061_s3 + $0x134] ss:$8 sps:$4 sm:$0xff]   ;;  %v2197_v3 = vld [vmem:[%s3061_s3 + $0x1f0] ss:$8 sps:$4 sm:$0xff]  }
 0x19e   :  { %v1166_v14 = vmul.f32 %v1150_v9, %v982_v35 }
 0x19f   :  { %v1167_v15 = vmul.f32 %v1151_v11, %v984_v37  ;;  %v2161_v37 = vld [vmem:[%s3061_s3 + $0x130] ss:$8 sps:$4 sm:$0xff]  }
 0x1a0   :  { %v1178_v16 = vpack.c.bf16 %v1166_v14, %v1162_v6 }
 0x1a1   :  { %v2233_v17 = vpop.eup %2232  ;;  %v1179_v18 = vpack.c.bf16 %v1167_v15, %v1163_v10 }
 0x1a2   :  { %v2235_v20 = vpop.eup %2234  ;;  %v1154_v21 = vmul.f32 %v2233_v17, %v498_v54  ;;  %v2164_v54 = vld [vmem:[%s3061_s3 + $0x140] ss:$8 sps:$4 sm:$0xff]  }
 0x1a3   :  { %v2237_v23 = vpop.eup %2236  ;;  %v1155_v24 = vmul.f32 %v2235_v20, %v500_v40  ;;  %1602 = vmatprep.mubr.bf16.mxu0 %v1179_v18  ;;  %v2172_v40 = vld [vmem:[%s3061_s3 + $0x164] ss:$8 sps:$4 sm:$0xff]  }
 0x1a4   :  { %v2239_v25 = vpop.eup %2238  ;;  %v1158_v26 = vmul.f32 %v2237_v23, %v502_v43  ;;  %1603 = vmatmul.mubr.bf16.vlgmr.msra.gmra.mrb[8].mxu0 %v1178_v16  ;;  %v1170_v27 = vmul.f32 %v1154_v21, %v2876_v38  ;;  %v2169_v38 = vld [vmem:[%s3061_s3 + $0x154] ss:$8 sps:$4 sm:$0xff]   ;;  %v2173_v43 = vld [vmem:[%s3061_s3 + $0x170] ss:$8 sps:$4 sm:$0xff]  }
 0x1a5   :  { %v1159_v28 = vmul.f32 %v2239_v25, %v504_v46  ;;  %v1171_v29 = vmul.f32 %v1155_v24, %v2878_v41  ;;  %1624 = vmatpush1.bf16.msra.mxu0 %v2152_v19  ;;  %v2170_v41 = vld [vmem:[%s3061_s3 + $0x160] ss:$8 sps:$4 sm:$0xff]  }
 0x1a6   :  { %v1174_v31 = vmul.f32 %v1158_v26, %v2880_v44  ;;  %1625 = vmatprep.subr.bf16.mxu0 %v2157_v22  ;;  %v2178_v44 = vld [vmem:[%s3061_s3 + $0x184] ss:$8 sps:$4 sm:$0xff]  }
 0x1a7   :  { %v1175_v33 = vmul.f32 %v1159_v28, %v994_v47 }
 0x1a8   :  { %v1182_v34 = vpack.c.bf16 %v1174_v31, %v1170_v27 }
 0x1a9   :  { %v1183_v35 = vpack.c.bf16 %v1175_v33, %v1171_v29  ;;  %1626 = vmatpush1.bf16.msra.mxu0 %v2155_v30 }
 0x1aa   :  { %1627 = vmatprep.subr.bf16.mxu0 %v2160_v32 }
 0x1ab   :  { %1612 = vmatprep.mubr.bf16.mxu0 %v1183_v35 }
 0x1ac   :  { %1613 = vmatmul.mubr.bf16.gmra.mrb[12].mxu0 %v1182_v34 }
 0x1ad   :  { %1628 = vmatpush1.bf16.msra.mxu0 %v2158_v36 }
 0x1ae   :  { %1629 = vmatprep.subr.bf16.mxu0 %v2163_v53 }
 0x1b1   :  { %1630 = vmatpush1.bf16.msra.mxu0 %v2161_v37 }
 0x1b2   :  { %1631 = vmatprep.subr.bf16.mxu0 %v2166_v8 }
 0x1b5   :  { %1632 = vmatpush1.bf16.msra.mxu0 %v2164_v54 }
 0x1b6   :  { %1633 = vmatprep.subr.bf16.mxu0 %v2169_v38 }
 0x1b9   :  { %1634 = vmatpush1.bf16.msra.mxu0 %v2167_v39 }
 0x1ba   :  { %1635 = vmatprep.subr.bf16.mxu0 %v2172_v40 }
 0x1bd   :  { %1636 = vmatpush1.bf16.msra.mxu0 %v2170_v41 }
 0x1be   :  { %1637 = vmatprep.subr.bf16.mxu0 %v2175_v42 }
 0x1bf   :  { %v2933_v45 = vpop.f32.mrb[8].mxu1 }
 0x1c0   :  { %v2935_v46 = vpop.f32.mrb[9].mxu1  ;;  %v1826_v62 = vmul.f32 -1.442695, %v2933_v45 }
 0x1c1   :  { %v2937_v47 = vpop.f32.mrb[10].mxu1  ;;  %1638 = vmatpush1.bf16.msra.mxu0 %v2173_v43  ;;  %v1827_v63 = vmul.f32 -1.442695, %v2935_v46 }
 0x1c2   :  { %v2942_v49 = vpop.f32.mrb[11].mxu1  ;;  %1639 = vmatprep.subr.bf16.mxu0 %v2178_v44  ;;  %v1830_v4 = vmul.f32 -1.442695, %v2937_v47  ;;  %2240 = vpow2.f32 %v1826_v62 }
 0x1c3   :  { %v1831_v6 = vmul.f32 -1.442695, %v2942_v49  ;;  %2242 = vpow2.f32 %v1827_v63 }
 0x1c4   :  { %2244 = vpow2.f32 %v1830_v4 }
 0x1c5   :  { %1640 = vmatpush1.bf16.msra.mxu0 %v2176_v48  ;;  %2246 = vpow2.f32 %v1831_v6 }
 0x1c6   :  { %1641 = vmatprep.subr.bf16.mxu0 %v2181_v50 }
 0x1c7   :  { %v2953_v1 = vpop.f32.mrb[12].mxu1 }
 0x1c8   :  { %v2955_v0 = vpop.f32.mrb[13].mxu1  ;;  %v1834_v9 = vmul.f32 -1.442695, %v2953_v1 }
 0x1c9   :  { %v2957_v2 = vpop.f32.mrb[14].mxu1  ;;  %1642 = vmatpush1.bf16.msra.mxu0 %v2179_v51  ;;  %v1835_v10 = vmul.f32 -1.442695, %v2955_v0 }
 0x1ca   :  { %v2962_v13 = vpop.f32.mrb[15].mxu1  ;;  %1643 = vmatprep.subr.bf16.mxu0 %v2184_v52  ;;  %v1838_v11 = vmul.f32 -1.442695, %v2957_v2  ;;  %2248 = vpow2.f32 %v1834_v9 }
 0x1cb   :  { %v1839_v14 = vmul.f32 -1.442695, %v2962_v13  ;;  %2250 = vpow2.f32 %v1835_v10 }
 0x1cc   :  { %v2241_v15 = vpop.eup %2240  ;;  %2252 = vpow2.f32 %v1838_v11 }
 0x1cd   :  { %1644 = vmatpush1.bf16.msra.mxu0 %v2182_v5  ;;  %v2243_v16 = vpop.eup %2242  ;;  %2254 = vpow2.f32 %v1839_v14  ;;  %v1100_v19 = vadd.f32 1.0, %v2241_v15 }
 0x1ce   :  { %1645 = vmatprep.subr.bf16.mxu0 %v2187_v7  ;;  %v2245_v17 = vpop.eup %2244  ;;  %v1101_v20 = vadd.f32 1.0, %v2243_v16 }
 0x1cf   :  { %v2247_v18 = vpop.eup %2246  ;;  %v1104_v21 = vadd.f32 1.0, %v2245_v17  ;;  %2256 = vrcp.f32 %v1100_v19 }
 0x1d0   :  { %v1105_v22 = vadd.f32 1.0, %v2247_v18  ;;  %2258 = vrcp.f32 %v1101_v20 }
 0x1d1   :  { %1646 = vmatpush1.bf16.msra.mxu0 %v2185_v12  ;;  %2260 = vrcp.f32 %v1104_v21 }
 0x1d2   :  { %1647 = vmatprep.subr.bf16.mxu0 %v2190_v55  ;;  %2262 = vrcp.f32 %v1105_v22 }
 0x1d4   :  { %v2249_v23 = vpop.eup %2248 }
 0x1d5   :  { %1648 = vmatpush1.bf16.msra.mxu0 %v2188_v56  ;;  %v2251_v24 = vpop.eup %2250  ;;  %v1108_v27 = vadd.f32 1.0, %v2249_v23 }
 0x1d6   :  { %1649 = vmatprep.subr.bf16.mxu0 %v2193_v57  ;;  %v2253_v25 = vpop.eup %2252  ;;  %v1109_v28 = vadd.f32 1.0, %v2251_v24 }
 0x1d7   :  { %v2255_v26 = vpop.eup %2254  ;;  %v1112_v29 = vadd.f32 1.0, %v2253_v25  ;;  %2264 = vrcp.f32 %v1108_v27 }
 0x1d8   :  { %v1113_v30 = vadd.f32 1.0, %v2255_v26  ;;  %2266 = vrcp.f32 %v1109_v28 }
 0x1d9   :  { %1650 = vmatpush1.bf16.msra.mxu0 %v2191_v58  ;;  %v2257_v31 = vpop.eup %2256  ;;  %2268 = vrcp.f32 %v1112_v29 }
 0x1da   :  { %1651 = vmatprep.subr.bf16.mxu0 %v2196_v59  ;;  %v2259_v32 = vpop.eup %2258  ;;  %2270 = vrcp.f32 %v1113_v30  ;;  %v1148_v35 = vmul.f32 %v2257_v31, %v2933_v45 }
 0x1db   :  { %v2261_v33 = vpop.eup %2260  ;;  %v1149_v36 = vmul.f32 %v2259_v32, %v2935_v46 }
 0x1dc   :  { %v2263_v34 = vpop.eup %2262  ;;  %v1152_v37 = vmul.f32 %v2261_v33, %v2937_v47 }
 0x1dd   :  { %1652 = vmatpush1.bf16.msra.mxu0 %v2194_v60  ;;  %v1153_v38 = vmul.f32 %v2263_v34, %v2942_v49 }
 0x1de   :  { %1653 = vmatprep.subr.bf16.mxu0 %v2199_v61 }
 0x1e1   :  { %1654 = vmatpush1.bf16.msra.mxu0 %v2197_v3  ;;  %v2265_v43 = vpop.eup %2264 }
 0x1e2   :  { %v2267_v48 = vpop.eup %2266  ;;  %v1156_v46 = vmul.f32 %v2265_v43, %v2953_v1 }
 0x1e3   :  { %v2269_v51 = vpop.eup %2268  ;;  %v1157_v5 = vmul.f32 %v2267_v48, %v2955_v0  ;;  %v2272_v0 = vld [vmem:[%s3058_s0] sm:$0xff] }
 0x1e4   :  { %v2271_v45 = vpop.eup %2270  ;;  %v1160_v7 = vmul.f32 %v2269_v51, %v2957_v2 }
 0x1e5   :  { %v1161_v55 = vmul.f32 %v2271_v45, %v2962_v13  ;;  %v2273_v13 = vld [vmem:[%s3058_s0 + $0x8] sm:$0xff] }
 0x1ff   :  { %v1031_v53 = vpop.f32.mrb[16].mxu1 }
 0x200   :  { %v1164_v8 = vmul.f32 %v1148_v35, %v1031_v53  ;;  %v1033_v54 = vpop.f32.mrb[17].mxu1 }
 0x201   :  { %v1165_v39 = vmul.f32 %v1149_v36, %v1033_v54  ;;  %v1035_v40 = vpop.f32.mrb[18].mxu1 }
 0x202   :  { %v1168_v41 = vmul.f32 %v1152_v37, %v1035_v40  ;;  %v1037_v42 = vpop.f32.mrb[19].mxu1 }
 0x203   :  { %v1169_v44 = vmul.f32 %v1153_v38, %v1037_v42 }
 0x204   :  { %v1180_v50 = vpack.c.bf16 %v1168_v41, %v1164_v8 }
 0x205   :  { %v1181_v52 = vpack.c.bf16 %v1169_v44, %v1165_v39 }
 0x207   :  { %v1041_v47 = vpop.f32.mrb[20].mxu1  ;;  %1655 = vmatprep.mubr.bf16.mxu0 %v1181_v52 }
 0x208   :  { %v1172_v49 = vmul.f32 %v1156_v46, %v1041_v47  ;;  %v1043_v12 = vpop.f32.mrb[21].mxu1  ;;  %1656 = vmatmul.mubr.bf16.vlgmr.msra.gmra.mrb[8].mxu0 %v1180_v50 }
 0x209   :  { %v1173_v56 = vmul.f32 %v1157_v5, %v1043_v12  ;;  %v1045_v57 = vpop.f32.mrb[22].mxu1 }
 0x20a   :  { %v1176_v58 = vmul.f32 %v1160_v7, %v1045_v57  ;;  %v1047_v59 = vpop.f32.mrb[23].mxu1 }
 0x20b   :  { %v1177_v60 = vmul.f32 %v1161_v55, %v1047_v59 }
 0x20c   :  { %v1184_v61 = vpack.c.bf16 %v1176_v58, %v1172_v49 }
 0x20d   :  { %v1185_v62 = vpack.c.bf16 %v1177_v60, %v1173_v56 }
 0x20f   :  { %1665 = vmatprep.mubr.bf16.mxu0 %v1185_v62 }
 0x210   :  { %1666 = vmatmul.mubr.bf16.gmra.mrb[12].mxu0 %v1184_v61 }
 0x2db   :  { %v1657_v1 = vpop.f32.mrb[8].mxu0 }
 0x2dc   :  { %v1676_v2 = vadd.f32 %v2272_v0, %v1657_v1  ;;  %v1659_v63 = vpop.f32.mrb[9].mxu0 }
 0x2dd   :  { %v1677_v3 = vadd.f32 %v2273_v13, %v1659_v63  ;;  %v1661_v4 = vpop.f32.mrb[10].mxu0 }
 0x2de   :  { %1684 = vst [vmem:[%s3062_s4] sm:$0xff] %v1676_v2  ;;  %v1663_v10 = vpop.f32.mrb[11].mxu0 }
 0x2e3   :  { %v1667_v15 = vpop.f32.mrb[12].mxu0 }
 0x2e4   :  { %v1669_v18 = vpop.f32.mrb[13].mxu0 }
 0x2e5   :  { %v2274_v6 = vld [vmem:[%s3058_s0 + $0x10] sm:$0xff]  ;;  %v1671_v21 = vpop.f32.mrb[14].mxu0 }
 0x2e6   :  { %v1678_v9 = vadd.f32 %v2274_v6, %v1661_v4  ;;  %1685 = vst [vmem:[%s3062_s4 + $0x8] sm:$0xff] %v1677_v3  ;;  %v1673_v24 = vpop.f32.mrb[15].mxu0 }
 0x2ed   :  { %v2275_v11 = vld [vmem:[%s3058_s0 + $0x18] sm:$0xff] }
 0x2ee   :  { %v1679_v14 = vadd.f32 %v2275_v11, %v1663_v10  ;;  %1686 = vst [vmem:[%s3062_s4 + $0x10] sm:$0xff] %v1678_v9 }
 0x2f0   :  { %1687 = vst [vmem:[%s3062_s4 + $0x18] sm:$0xff] %v1679_v14 }
 0x2f7   :  { %v2276_v16 = vld [vmem:[%s3058_s0 + $0x20] sm:$0xff]  ;;  %v2277_v19 = vld [vmem:[%s3058_s0 + $0x28] sm:$0xff] }
 0x2f8   :  { %v1680_v17 = vadd.f32 %v2276_v16, %v1667_v15  ;;  %v1681_v20 = vadd.f32 %v2277_v19, %v1669_v18 }
 0x2fa   :  { %1688 = vst [vmem:[%s3062_s4 + $0x20] sm:$0xff] %v1680_v17 }
 0x301   :  { %v2278_v22 = vld [vmem:[%s3058_s0 + $0x30] sm:$0xff] }
 0x302   :  { %v1682_v23 = vadd.f32 %v2278_v22, %v1671_v21  ;;  %1689 = vst [vmem:[%s3062_s4 + $0x28] sm:$0xff] %v1681_v20 }
 0x309   :  { %v2279_v25 = vld [vmem:[%s3058_s0 + $0x38] sm:$0xff] }
 0x30a   :  { %v1683_v26 = vadd.f32 %v2279_v25, %v1673_v24  ;;  %1690 = vst [vmem:[%s3062_s4 + $0x30] sm:$0xff] %v1682_v23 }
 0x30c   :  { %1691 = vst [vmem:[%s3062_s4 + $0x38] sm:$0xff] %v1683_v26 }

</bundles_post_ra>
